<compile_context>
chip_gen: v6e
topology: v6e:2x2x1
jax: 0.10.0
libtpu: 0.0.40
codegen_flags: <defaults>
</compile_context>

<pallas_src>
import functools

import jax
import jax.numpy as jnp
from jax import lax
from jax.experimental import pallas as pl
from jax.experimental.pallas import tpu as pltpu


def _bconv_kernel(x_ref, w_ref, o_ref, col_ref, *, K):
    """One grid step = (batch n, row block r, C_out block co).

    x_ref:   (1, Hp, Wp, C_in)     zero-padded image (resident across r/co steps)
    w_ref:   (K*K*C_in, TCO)       pre-binarized, reshaped weight tile
    o_ref:   (1, TH, W, TCO)       output row-block x C_out tile
    col_ref: (TH*W, K*K*C_in)      VMEM scratch: cached im2col slab
    """
    _, TH, W, TCO = o_ref.shape
    C_in = x_ref.shape[3]
    r = pl.program_id(1)                       # row block
    co = pl.program_id(2)                      # innermost: C_out block
    M = TH * W

    # Build the im2col slab once per row block; reuse it for every C_out tile.
    @pl.when(co == 0)
    def _build_im2col():
        row0 = pl.multiple_of(r * TH, TH)
        cols = []
        for kh in range(K):
            for kw in range(K):
                patch = x_ref[0, pl.ds(row0 + kh, TH), pl.ds(kw, W), :]
                cols.append(patch.reshape(M, C_in))
        # Column order (kh, kw, c_in) matches the wrapper's weight reshape.
        col_ref[...] = jnp.concatenate(cols, axis=-1).astype(col_ref.dtype)

    acc = jnp.dot(col_ref[...], w_ref[...], preferred_element_type=jnp.float32)
    o_ref[0] = acc.reshape(TH, W, TCO).astype(o_ref.dtype)


def _pick_row_tile(H, W, target_rows=256):
    """Largest divisor of H such that tile_rows * W ~= target matmul M-rows."""
    th = max(1, min(H, target_rows // max(W, 1)))
    while H % th:
        th -= 1
    return th


def bconv_forward_nhwc(x_nhwc, weights_oihw, *, stride=1, padding=1,
                       compute_dtype=jnp.float32, target_rows=256):
    """Binary-weight 'same' conv2d: conv(x, sign(w)). NHWC activations."""
    # TODO(synk): only stride=1, dilation=1, groups=1 implemented (module defaults).
    assert stride == 1, "only stride=1 implemented"
    N, H, W, C_in = x_nhwc.shape
    C_out, C_in_w, K, K2 = weights_oihw.shape
    assert C_in_w == C_in and K == K2
    assert 2 * padding == K - 1, "only 'same' convolution geometry implemented"

    # (1) Binarize ONCE here (hoisted out of the per-step grid work).
    w_sign = jnp.sign(weights_oihw).astype(compute_dtype)
    # OIHW -> HWIO -> (K*K*C_in, C_out); row order (kh, kw, c_in) matches the
    # kernel's im2col column order.
    w_mat = jnp.transpose(w_sign, (2, 3, 1, 0)).reshape(K * K * C_in, C_out)

    # (2) Lane-dense output: pad C_out up to a multiple of 128.
    TCO = 128
    C_out_pad = ((C_out + TCO - 1) // TCO) * TCO
    w_mat = jnp.pad(w_mat, ((0, 0), (0, C_out_pad - C_out)))

    # (3) Spatial zero padding of the activations.
    # TODO(synk): fold the halo into the kernel (zeroed VMEM scratch + interior
    # DMA) to drop this extra HBM round trip.
    P = padding
    xp = jnp.pad(x_nhwc, ((0, 0), (P, P), (P, P), (0, 0)))
    Hp, Wp = H + 2 * P, W + 2 * P

    TH = _pick_row_tile(H, W, target_rows)     # ~256 output rows per matmul
    n_row = H // TH
    n_co = C_out_pad // TCO

    kernel = functools.partial(_bconv_kernel, K=K)

    # Explicit VMEM budget (double-buffered blocks + scratch) + cost hint.
    bpe_x = jnp.dtype(x_nhwc.dtype).itemsize
    bpe_w = jnp.dtype(compute_dtype).itemsize
    block_bytes = (Hp * Wp * C_in * bpe_x              # resident padded image
                   + K * K * C_in * TCO * bpe_w        # weight tile
                   + TH * W * TCO * bpe_x)             # output tile
    scratch_bytes = TH * W * K * K * C_in * bpe_w      # cached im2col slab
    vmem_limit = int(min(48 << 20,
                         max(16 << 20, 2 * block_bytes + scratch_bytes + (4 << 20))))
    cost = pl.CostEstimate(
        flops=2 * N * H * W * K * K * C_in * C_out_pad,
        transcendentals=0,
        bytes_accessed=int(N * Hp * Wp * C_in * bpe_x
                           + K * K * C_in * C_out_pad * bpe_w
                           + N * H * W * C_out_pad * bpe_x))

    out = pl.pallas_call(
        kernel,
        out_shape=jax.ShapeDtypeStruct((N, H, W, C_out_pad), x_nhwc.dtype),
        grid=(N, n_row, n_co),
        in_specs=[
            # Full padded image per batch element; block index ignores r/co so
            # it stays resident in VMEM across the inner grid axes.
            pl.BlockSpec((1, Hp, Wp, C_in), lambda n, r, co: (n, 0, 0, 0)),
            # One 128-wide C_out tile of the binarized weight matrix.
            pl.BlockSpec((K * K * C_in, TCO), lambda n, r, co: (0, co)),
        ],
        out_specs=pl.BlockSpec((1, TH, W, TCO), lambda n, r, co: (n, r, 0, co)),
        scratch_shapes=[pltpu.VMEM((TH * W, K * K * C_in), compute_dtype)],
        compiler_params=pltpu.CompilerParams(
            # co is innermost and "arbitrary": the im2col scratch computed at
            # co==0 is reused sequentially across the C_out tiles of one (n, r).
            dimension_semantics=("parallel", "parallel", "arbitrary"),
            vmem_limit_bytes=vmem_limit),
        cost_estimate=cost,
    )(xp, w_mat)

    return out[..., :C_out]


def bconv_forward(x_nchw, weights_oihw, **kwargs):
    """PyTorch-convention (NCHW / OIHW) wrapper around the NHWC kernel."""
    x_nhwc = jnp.transpose(x_nchw, (0, 2, 3, 1))
    out_nhwc = bconv_forward_nhwc(x_nhwc, weights_oihw, **kwargs)
    return jnp.transpose(out_nhwc, (0, 3, 1, 2))


def init_bconv_weights(key, in_chn, out_chn, kernel_size=3, gain=2.0):
    """Deterministic xavier_normal_(gain=2.0) equivalent: OIHW weights."""
    fan_in = in_chn * kernel_size * kernel_size
    fan_out = out_chn * kernel_size * kernel_size
    std = gain * (2.0 / (fan_in + fan_out)) ** 0.5
    shape = (out_chn, in_chn, kernel_size, kernel_size)
    return std * jax.random.normal(key, shape, dtype=jnp.float32)


def _reference_bconv(x_nchw, weights_oihw, padding=1):
    """Pure-JAX reference: conv2d with sign(weights)."""
    bw = jnp.sign(weights_oihw)
    return lax.conv_general_dilated(
        x_nchw, bw, window_strides=(1, 1),
        padding=((padding, padding), (padding, padding)),
        dimension_numbers=("NCHW", "OIHW", "NCHW"))


if __name__ == "__main__":
    key = jax.random.PRNGKey(0)
    k_x, k_w = jax.random.split(key)

    N, C_in, C_out, H, W = 2, 4, 8, 16, 16
    x = jax.random.normal(k_x, (N, C_in, H, W), dtype=jnp.float32)
    weights = init_bconv_weights(k_w, C_in, C_out, kernel_size=3, gain=2.0)

    # f32 path: matches the f32 reference tightly.
    out = jax.block_until_ready(bconv_forward(x, weights))
    ref = _reference_bconv(x, weights)
    assert out.shape == ref.shape == (N, C_out, H, W)
    assert jnp.allclose(out, ref, atol=1e-4, rtol=1e-4), "f32 mismatch vs reference"

    # bf16-operand MXU path: weights (+/-1, 0) are exact in bf16; activations
    # get rounded, so compare against a reference computed on bf16-rounded x.
    out_bf16 = jax.block_until_ready(
        bconv_forward(x, weights, compute_dtype=jnp.bfloat16))
    ref_bf16 = _reference_bconv(x.astype(jnp.bfloat16).astype(jnp.float32), weights)
    assert jnp.allclose(out_bf16, ref_bf16, atol=1e-2, rtol=1e-2), "bf16 mismatch"

    print("KERNEL_OK")
</pallas_src>

<mosaic_0001>
module attributes {stable_mosaic.version = 11 : i64} {
  func.func @_bconv_kernel(%arg0: i32, %arg1: i32, %arg2: i32, %arg3: memref<1x18x18x4xf32, #tpu.memory_space<vmem>>, %arg4: memref<36x128xf32, #tpu.memory_space<vmem>>, %arg5: memref<1x16x16x128xf32, #tpu.memory_space<vmem>>, %arg6: memref<256x36xf32, #tpu.memory_space<vmem>>) attributes {dimension_semantics = [#tpu.dimension_semantics<parallel>, #tpu.dimension_semantics<parallel>, #tpu.dimension_semantics<arbitrary>], iteration_bounds = array<i64: 2, 1, 1>, scalar_prefetch = 0 : i64, scratch_operands = 1 : i64, tpu.core_type = #tpu.core_type<tc>, window_params = [{transform_indices = @transform_0, window_bounds = array<i64: 1, 18, 18, 4>}, {transform_indices = @transform_1, window_bounds = array<i64: 36, 128>}, {transform_indices = @transform_2, window_bounds = array<i64: 1, 16, 16, 128>}]} {
    %c0_i32 = arith.constant 0 : i32
    %0 = arith.cmpi eq, %arg2, %c0_i32 : i32
    %1 = arith.extui %0 : i1 to i32
    %c0_i32_0 = arith.constant 0 : i32
    %2 = arith.cmpi ne, %1, %c0_i32_0 : i32
    scf.if %2 {
      %c16_i32 = arith.constant 16 : i32
      %10 = arith.muli %arg1, %c16_i32 : i32
      %11 = tpu.assume_multiple %10, 16 : i32
      %c0_i32_8 = arith.constant 0 : i32
      %12 = arith.addi %11, %c0_i32_8 : i32
      %c0_9 = arith.constant 0 : index
      %13 = arith.index_cast %12 : i32 to index
      %c0_10 = arith.constant 0 : index
      %c0_11 = arith.constant 0 : index
      %14 = vector.load %arg3[%c0_9, %13, %c0_10, %c0_11] : memref<1x18x18x4xf32, #tpu.memory_space<vmem>>, vector<1x16x16x4xf32>
      %15 = vector.shape_cast %14 : vector<1x16x16x4xf32> to vector<16x16x4xf32>
      %16 = vector.shape_cast %15 : vector<16x16x4xf32> to vector<256x4xf32>
      %c0_i32_12 = arith.constant 0 : i32
      %17 = arith.addi %11, %c0_i32_12 : i32
      %c0_13 = arith.constant 0 : index
      %18 = arith.index_cast %17 : i32 to index
      %c1 = arith.constant 1 : index
      %c0_14 = arith.constant 0 : index
      %19 = vector.load %arg3[%c0_13, %18, %c1, %c0_14] : memref<1x18x18x4xf32, #tpu.memory_space<vmem>>, vector<1x16x16x4xf32>
      %20 = vector.shape_cast %19 : vector<1x16x16x4xf32> to vector<16x16x4xf32>
      %21 = vector.shape_cast %20 : vector<16x16x4xf32> to vector<256x4xf32>
      %c0_i32_15 = arith.constant 0 : i32
      %22 = arith.addi %11, %c0_i32_15 : i32
      %c0_16 = arith.constant 0 : index
      %23 = arith.index_cast %22 : i32 to index
      %c2 = arith.constant 2 : index
      %c0_17 = arith.constant 0 : index
      %24 = vector.load %arg3[%c0_16, %23, %c2, %c0_17] : memref<1x18x18x4xf32, #tpu.memory_space<vmem>>, vector<1x16x16x4xf32>
      %25 = vector.shape_cast %24 : vector<1x16x16x4xf32> to vector<16x16x4xf32>
      %26 = vector.shape_cast %25 : vector<16x16x4xf32> to vector<256x4xf32>
      %c1_i32 = arith.constant 1 : i32
      %27 = arith.addi %11, %c1_i32 : i32
      %c0_18 = arith.constant 0 : index
      %28 = arith.index_cast %27 : i32 to index
      %c0_19 = arith.constant 0 : index
      %c0_20 = arith.constant 0 : index
      %29 = vector.load %arg3[%c0_18, %28, %c0_19, %c0_20] : memref<1x18x18x4xf32, #tpu.memory_space<vmem>>, vector<1x16x16x4xf32>
      %30 = vector.shape_cast %29 : vector<1x16x16x4xf32> to vector<16x16x4xf32>
      %31 = vector.shape_cast %30 : vector<16x16x4xf32> to vector<256x4xf32>
      %c1_i32_21 = arith.constant 1 : i32
      %32 = arith.addi %11, %c1_i32_21 : i32
      %c0_22 = arith.constant 0 : index
      %33 = arith.index_cast %32 : i32 to index
      %c1_23 = arith.constant 1 : index
      %c0_24 = arith.constant 0 : index
      %34 = vector.load %arg3[%c0_22, %33, %c1_23, %c0_24] : memref<1x18x18x4xf32, #tpu.memory_space<vmem>>, vector<1x16x16x4xf32>
      %35 = vector.shape_cast %34 : vector<1x16x16x4xf32> to vector<16x16x4xf32>
      %36 = vector.shape_cast %35 : vector<16x16x4xf32> to vector<256x4xf32>
      %c1_i32_25 = arith.constant 1 : i32
      %37 = arith.addi %11, %c1_i32_25 : i32
      %c0_26 = arith.constant 0 : index
      %38 = arith.index_cast %37 : i32 to index
      %c2_27 = arith.constant 2 : index
      %c0_28 = arith.constant 0 : index
      %39 = vector.load %arg3[%c0_26, %38, %c2_27, %c0_28] : memref<1x18x18x4xf32, #tpu.memory_space<vmem>>, vector<1x16x16x4xf32>
      %40 = vector.shape_cast %39 : vector<1x16x16x4xf32> to vector<16x16x4xf32>
      %41 = vector.shape_cast %40 : vector<16x16x4xf32> to vector<256x4xf32>
      %c2_i32 = arith.constant 2 : i32
      %42 = arith.addi %11, %c2_i32 : i32
      %c0_29 = arith.constant 0 : index
      %43 = arith.index_cast %42 : i32 to index
      %c0_30 = arith.constant 0 : index
      %c0_31 = arith.constant 0 : index
      %44 = vector.load %arg3[%c0_29, %43, %c0_30, %c0_31] : memref<1x18x18x4xf32, #tpu.memory_space<vmem>>, vector<1x16x16x4xf32>
      %45 = vector.shape_cast %44 : vector<1x16x16x4xf32> to vector<16x16x4xf32>
      %46 = vector.shape_cast %45 : vector<16x16x4xf32> to vector<256x4xf32>
      %c2_i32_32 = arith.constant 2 : i32
      %47 = arith.addi %11, %c2_i32_32 : i32
      %c0_33 = arith.constant 0 : index
      %48 = arith.index_cast %47 : i32 to index
      %c1_34 = arith.constant 1 : index
      %c0_35 = arith.constant 0 : index
      %49 = vector.load %arg3[%c0_33, %48, %c1_34, %c0_35] : memref<1x18x18x4xf32, #tpu.memory_space<vmem>>, vector<1x16x16x4xf32>
      %50 = vector.shape_cast %49 : vector<1x16x16x4xf32> to vector<16x16x4xf32>
      %51 = vector.shape_cast %50 : vector<16x16x4xf32> to vector<256x4xf32>
      %c2_i32_36 = arith.constant 2 : i32
      %52 = arith.addi %11, %c2_i32_36 : i32
      %c0_37 = arith.constant 0 : index
      %53 = arith.index_cast %52 : i32 to index
      %c2_38 = arith.constant 2 : index
      %c0_39 = arith.constant 0 : index
      %54 = vector.load %arg3[%c0_37, %53, %c2_38, %c0_39] : memref<1x18x18x4xf32, #tpu.memory_space<vmem>>, vector<1x16x16x4xf32>
      %55 = vector.shape_cast %54 : vector<1x16x16x4xf32> to vector<16x16x4xf32>
      %56 = vector.shape_cast %55 : vector<16x16x4xf32> to vector<256x4xf32>
      %57 = tpu.concatenate %16, %21, %26, %31, %36, %41, %46, %51, %56 in 1 : vector<256x4xf32>, vector<256x4xf32>, vector<256x4xf32>, vector<256x4xf32>, vector<256x4xf32>, vector<256x4xf32>, vector<256x4xf32>, vector<256x4xf32>, vector<256x4xf32> -> vector<256x36xf32>
      %c0_40 = arith.constant 0 : index
      %c0_41 = arith.constant 0 : index
      %58 = vector.load %arg6[%c0_40, %c0_41] : memref<256x36xf32, #tpu.memory_space<vmem>>, vector<256x36xf32>
      tpu.vector_store %arg6[%c0_40, %c0_41], %57 {strides = array<i32>} : memref<256x36xf32, #tpu.memory_space<vmem>>, vector<256x36xf32>,
    } else {
    }
    %c0 = arith.constant 0 : index
    %c0_1 = arith.constant 0 : index
    %3 = vector.load %arg6[%c0, %c0_1] : memref<256x36xf32, #tpu.memory_space<vmem>>, vector<256x36xf32>
    %c0_2 = arith.constant 0 : index
    %c0_3 = arith.constant 0 : index
    %4 = vector.load %arg4[%c0_2, %c0_3] : memref<36x128xf32, #tpu.memory_space<vmem>>, vector<36x128xf32>
    %cst = arith.constant dense<0.000000e+00> : vector<256x128xf32>
    %5 = tpu.matmul %3, %4, %cst {dimension_numbers = #tpu.dot_dimension_numbers<[1], [0], [0], [1], [0, 0, 1, 1], [], []>} : vector<256x36xf32>, vector<36x128xf32>, vector<256x128xf32> -> vector<256x128xf32>
    %6 = vector.shape_cast %5 : vector<256x128xf32> to vector<16x16x128xf32>
    %c0_4 = arith.constant 0 : index
    %c0_5 = arith.constant 0 : index
    %c0_6 = arith.constant 0 : index
    %c0_7 = arith.constant 0 : index
    %7 = vector.load %arg5[%c0_4, %c0_5, %c0_6, %c0_7] : memref<1x16x16x128xf32, #tpu.memory_space<vmem>>, vector<1x16x16x128xf32>
    %8 = vector.shape_cast %7 : vector<1x16x16x128xf32> to vector<16x16x128xf32>
    %9 = vector.shape_cast %6 : vector<16x16x128xf32> to vector<1x16x16x128xf32>
    tpu.vector_store %arg5[%c0_4, %c0_5, %c0_6, %c0_7], %9 {strides = array<i32>} : memref<1x16x16x128xf32, #tpu.memory_space<vmem>>, vector<1x16x16x128xf32>,
    return
  }
  func.func @transform_0(%arg0: i32, %arg1: i32, %arg2: i32) -> (i32, i32, i32, i32) {
    %c0_i32 = arith.constant 0 : i32
    %c0_i32_0 = arith.constant 0 : i32
    %c0_i32_1 = arith.constant 0 : i32
    %c0_i32_2 = arith.constant 0 : i32
    return %arg0, %c0_i32, %c0_i32_0, %c0_i32_1 : i32, i32, i32, i32
  }
  func.func @transform_1(%arg0: i32, %arg1: i32, %arg2: i32) -> (i32, i32) {
    %c0_i32 = arith.constant 0 : i32
    %c0_i32_0 = arith.constant 0 : i32
    return %c0_i32, %arg2 : i32, i32
  }
  func.func @transform_2(%arg0: i32, %arg1: i32, %arg2: i32) -> (i32, i32, i32, i32) {
    %c0_i32 = arith.constant 0 : i32
    %c0_i32_0 = arith.constant 0 : i32
    return %arg0, %arg1, %c0_i32, %arg2 : i32, i32, i32, i32
  }
}

</mosaic_0001>

<bundles_post_ra>
// kernel: tpu_custom_call.1
= control target key start
LH: loop header
LB: loop body
LE: loop exit
PB: predicated region body
PF: predicated region fallthrough
CT: control target
= control target key end

     0   :  { %7 = vsyncpa [#allocation4], 0  ;;  %s4411_s0 = inlined_call_operand.vmem [shape: f32[2,18,18,4], index: 0, kind: input, shape index: {}]   ;;  %s4412_s1 = inlined_call_operand.vmem [shape: f32[36,128], index: 1, kind: input, shape index: {}]   ;;  %s4413_s2 = inlined_call_operand.hbm [shape: f32[2,16,16,128], index: 2, kind: output, shape index: {}]  }
   0x1   :  { %9 = vsyncpa [#allocation4 + $0x1], 0  ;;  %s2832_s9 = smov 0   ;;  %s2834_s10 = smov 0  }
   0x2   :  { %s2836_s11 = smov 0   ;;  %s2838_s12 = smov 0  }
   0x3   :  { %s2840_s13 = smov 0   ;;  %s2842_s14 = smov 0  }
   0x4 LB: > { %s2320_s15 = sadd.s32 4294967295, %s2805_s14   ;;  %s2321_s16 = sadd.s32 4294967294, %s2805_s14   ;;  %s2805_s14 = sphi %s2842_s14, %s15_s14   ;;  %s2801_s13 = sphi %s2840_s13, %s4569_s13   ;;  %s2797_s12 = sphi %s2838_s12, %s4568_s12   ;;  %s2793_s11 = sphi %s2836_s11, %s4567_s11   ;;  %s2789_s10 = sphi %s2834_s10, %s4566_s10   ;;  %s2785_s9 = sphi %s2832_s9, %s4565_s9  }
   0x5   : > { %s34_s17 = sadd.s32 1, %s2801_s13  ;;  %s97_s18 = sadd.s32 1, %s2793_s11 }
   0x6   : > { %p36_p0 = scmp.ge.s32.totalorder %s34_s17, 2  ;;  %p107_p1 = scmp.ne.s32.totalorder %s2793_s11, %s2789_s10 }
   0x7   : > { %p108_p2 = scmp.eq.s32.totalorder %s2320_s15, 1  ;;  %p113_p3 = scmp.ne.s32.totalorder %s2789_s10, %s2785_s9 }
   0x8   : > { %s4571_s17 = smov (%p36_p0, %s34_s17), 0  ;;  %p114_p5 = scmp.eq.s32.totalorder %s2321_s16, 1 }
   0x9   : > { %p2872_p4 = por %p108_p2, %p107_p1  ;;  %s90_s20 = ssub.s32 %s2801_s13, %s4571_s17 }
   0xa   : > { %p2325_p6 = scmp.ge.s32.totalorder %s2805_s14, 1  ;;  %p95_p7 = scmp.eq.s32.totalorder %s90_s20, 0 }
   0xb   : > { %p2879_p8 = por %p114_p5, %p113_p3  ;;  %p147_p9 = scmp.lt.s32.totalorder %s2805_s14, 3 }
   0xc   : > { %s2885_s22 = scalar_select %p95_p7, %s2793_s11, %s97_s18  }
   0xd   : > { %p148_p10 = pnand %p2325_p6, %p147_p9 }
   0xf   : > { %151 = sbr.rel (%p148_p10) target bundleno = 870 (0x366), region = 28 }
  0x14   : > { %p173_p11 = scmp.lt.s32.totalorder %s2797_s12, 1  ;;  %s2807_s28 = smov 4   ;;  %vm1508_vm0 = vcmask 31744   ;;  %vm1541_vm1 = vcmask 64512   ;;  %vm1939_vm2 = vcmask 1043456   ;;  %vm1574_vm3 = vcmask 97280  }
  0x15   : > { %s2808_s29 = smov 8   ;;  %s2809_s30 = smov 12   ;;  %vm1607_vm4 = vcmask 130048   ;;  %vm1640_vm5 = vcmask 162816   ;;  %vm1673_vm6 = vcmask 195584   ;;  %vm1706_vm7 = vcmask 228352  }
  0x16   : > { %s174_s23 = scalar_select %p173_p11, %s2797_s12, 1  ;;  %vm1739_vm8 = vcmask 261120   ;;  %vm1772_vm9 = vcmask 293888  }
  0x17   : > { %s2810_s3 = smov 16   ;;  %s2811_s4 = smov 20  }
  0x18   : > { %s2664_s24 = smul.u32 432, %s174_s23  ;;  %s2812_s5 = smov 24  }
  0x19   : > { %s2813_s6 = smov 28   ;;  %s2814_s15 = smov 32  }
  0x1a   : > { %s2892_s27 = scalar_lea.vmem %s4411_s0, %s2664_s24  ;;  %s2815_s16 = smov [#allocation3]  }
  0x1b   : > { %v2895_v0 = vld [vmem:[%s2892_s27 + $0x19] sm:$0xff]  ;;  %v222_v1 = vld [vmem:[%s2892_s27 + $0x1] sm:$0xff]  ;;  %v223_v3 = vld [vmem:[%s2892_s27 + $0x9] sm:$0xff]  ;;  %s2733_s18 = sshll.u32 %s2815_s16, 4  ;;  %s2734_s18 = int_to_ptr.vmem [resolvable:$false] %s2733_s18 }
  0x1c   : > { %520 = vrot.lane.b32.xlu1 %v2895_v0, %s2807_s28  ;;  %516 = vrot.lane.b32.xlu0 %v222_v1, %s2807_s28  ;;  %v2902_v2 = vld [vmem:[%s2892_s27 + $0x21] sm:$0xff]  ;;  %v2909_v4 = vld [vmem:[%s2892_s27 + $0x39] sm:$0xff]  ;;  %s2735_s20 = scalar_lea.vmem %s2734_s18, 8192 }
  0x1d   : > { %v2912_v5 = vld [vmem:[%s2892_s27 + $0x31] sm:$0xff]  ;;  %v2922_v7 = vld [vmem:[%s2892_s27 + $0x49] sm:$0xff]  ;;  %v2932_v9 = vld [vmem:[%s2892_s27 + $0x61] sm:$0xff] }
  0x1e   : > { %v2919_v6 = vld [vmem:[%s2892_s27 + $0x51] sm:$0xff]  ;;  %v2929_v8 = vld [vmem:[%s2892_s27 + $0x69] sm:$0xff]  ;;  %v2939_v10 = vld [vmem:[%s2892_s27 + $0x81] sm:$0xff] }
  0x1f   : > { %v2942_v11 = vld [vmem:[%s2892_s27 + $0x79] sm:$0xff]  ;;  %v2952_v13 = vld [vmem:[%s2892_s27 + $0x91] sm:$0xff]  ;;  %v236_v15 = vld [vmem:[%s2892_s27 + $0xa9] sm:$0xff] }
  0x20   : > { %522 = vrot.lane.b32.xlu1 %v2902_v2, %s2807_s28  ;;  %518 = vrot.lane.b32.xlu0 %v223_v3, %s2807_s28  ;;  %v2949_v12 = vld [vmem:[%s2892_s27 + $0x99] sm:$0xff]  ;;  %v237_v14 = vld [vmem:[%s2892_s27 + $0xb1] sm:$0xff] }
  0x21   : > { %v239_v16 = vld [vmem:[%s2892_s27 + $0xc9] sm:$0xff]  ;;  %v238_v17 = vld [vmem:[%s2892_s27 + $0xc1] sm:$0xff]  ;;  %v2970_v19 = vld [vmem:[%s2892_s27 + $0xd9] sm:$0xff] }
  0x22   : > { %v2967_v18 = vld [vmem:[%s2892_s27 + $0xe1] sm:$0xff]  ;;  %v2977_v20 = vld [vmem:[%s2892_s27 + $0xf9] sm:$0xff]  ;;  %v2980_v21 = vld [vmem:[%s2892_s27 + $0xf1] sm:$0xff] }
  0x23   : > { %4459 = vst [vmem:[#allocation6_spill] sm:$0xff] %v2977_v20  ;;  %4460 = vst [vmem:[#allocation7_spill] sm:$0xff] %v2980_v21  ;;  %v2987_v22 = vld [vmem:[%s2892_s27 + $0x111] sm:$0xff]  ;;  %v2990_v23 = vld [vmem:[%s2892_s27 + $0x109] sm:$0xff] }
  0x24   : > { %526 = vrot.lane.b32.xlu1 %v2909_v4, %s2807_s28  ;;  %524 = vrot.lane.b32.xlu0 %v2912_v5, %s2807_s28  ;;  %4461 = vst [vmem:[#allocation8_spill] sm:$0xff] %v2987_v22  ;;  %4462 = vst [vmem:[#allocation9_spill] sm:$0xff] %v2990_v23  ;;  %v247_v24 = vld [vmem:[%s2892_s27 + $0x129] sm:$0xff]  ;;  %v2998_v25 = vld [vmem:[%s2892_s27 + $0x121] sm:$0xff] }
  0x25   : > { %4463 = vst [vmem:[#allocation10_spill] sm:$0xff] %v2998_v25  ;;  %v249_v26 = vld [vmem:[%s2892_s27 + $0x141] sm:$0xff]  ;;  %v248_v27 = vld [vmem:[%s2892_s27 + $0x139] sm:$0xff]  ;;  %v250_v29 = vld [vmem:[%s2892_s27 + $0x151] sm:$0xff] }
  0x26   : > { %v251_v28 = vld [vmem:[%s2892_s27 + $0x159] sm:$0xff]  ;;  %v253_v30 = vld [vmem:[%s2892_s27 + $0x171] sm:$0xff]  ;;  %v252_v31 = vld [vmem:[%s2892_s27 + $0x169] sm:$0xff] }
  0x27   : > { %v255_v32 = vld [vmem:[%s2892_s27 + $0xa] sm:$0xff]  ;;  %v254_v33 = vld [vmem:[%s2892_s27 + $0x2] sm:$0xff]  ;;  %v3023_v35 = vld [vmem:[%s2892_s27 + $0x1a] sm:$0xff] }
  0x28   : > { %530 = vrot.lane.b32.xlu1 %v2919_v6, %s2807_s28  ;;  %528 = vrot.lane.b32.xlu0 %v2922_v7, %s2807_s28  ;;  %v3020_v34 = vld [vmem:[%s2892_s27 + $0x22] sm:$0xff]  ;;  %v3030_v36 = vld [vmem:[%s2892_s27 + $0x3a] sm:$0xff] }
  0x29   : > { %4464 = vst [vmem:[#allocation11_spill] sm:$0xff] %v3030_v36  ;;  %v3033_v37 = vld [vmem:[%s2892_s27 + $0x32] sm:$0xff]  ;;  %v3043_v39 = vld [vmem:[%s2892_s27 + $0x4a] sm:$0xff]  ;;  %v3053_v41 = vld [vmem:[%s2892_s27 + $0x62] sm:$0xff] }
  0x2a   : > { %4465 = vst [vmem:[#allocation12_spill] sm:$0xff] %v3033_v37  ;;  %v3040_v38 = vld [vmem:[%s2892_s27 + $0x52] sm:$0xff]  ;;  %4467 = vst [vmem:[#allocation14_spill] sm:$0xff] %v3043_v39  ;;  %v3050_v40 = vld [vmem:[%s2892_s27 + $0x6a] sm:$0xff] }
  0x2b   : > { %4466 = vst [vmem:[#allocation13_spill] sm:$0xff] %v3040_v38  ;;  %4468 = vst [vmem:[#allocation15_spill] sm:$0xff] %v3050_v40  ;;  %v265_v42 = vld [vmem:[%s2892_s27 + $0x82] sm:$0xff]  ;;  %v264_v43 = vld [vmem:[%s2892_s27 + $0x7a] sm:$0xff] }
  0x2c   : > { %534 = vrot.lane.b32.xlu1 %v2929_v8, %s2807_s28  ;;  %532 = vrot.lane.b32.xlu0 %v2932_v9, %s2807_s28  ;;  %4469 = vst [vmem:[#allocation16_spill] sm:$0xff] %v3053_v41  ;;  %v267_v44 = vld [vmem:[%s2892_s27 + $0x9a] sm:$0xff]  ;;  %v266_v45 = vld [vmem:[%s2892_s27 + $0x92] sm:$0xff] }
  0x2d   : > { %v269_v46 = vld [vmem:[%s2892_s27 + $0xb2] sm:$0xff]  ;;  %v268_v47 = vld [vmem:[%s2892_s27 + $0xaa] sm:$0xff]  ;;  %v270_v49 = vld [vmem:[%s2892_s27 + $0xc2] sm:$0xff] }
  0x2e   : > { %v271_v48 = vld [vmem:[%s2892_s27 + $0xca] sm:$0xff]  ;;  %v3076_v50 = vld [vmem:[%s2892_s27 + $0xe2] sm:$0xff]  ;;  %v3079_v51 = vld [vmem:[%s2892_s27 + $0xda] sm:$0xff] }
  0x2f   : > { %v3086_v52 = vld [vmem:[%s2892_s27 + $0xfa] sm:$0xff]  ;;  %v3089_v53 = vld [vmem:[%s2892_s27 + $0xf2] sm:$0xff]  ;;  %v3099_v55 = vld [vmem:[%s2892_s27 + $0x10a] sm:$0xff] }
  0x30   : > { %538 = vrot.lane.b32.xlu1 %v2939_v10, %s2807_s28  ;;  %536 = vrot.lane.b32.xlu0 %v2942_v11, %s2807_s28  ;;  %4470 = vst [vmem:[#allocation17_spill] sm:$0xff] %v3086_v52  ;;  %4471 = vst [vmem:[#allocation18_spill] sm:$0xff] %v3089_v53  ;;  %v3096_v54 = vld [vmem:[%s2892_s27 + $0x112] sm:$0xff]  ;;  %v3106_v56 = vld [vmem:[%s2892_s27 + $0x12a] sm:$0xff] }
  0x31   : > { %4472 = vst [vmem:[#allocation19_spill] sm:$0xff] %v3096_v54  ;;  %4473 = vst [vmem:[#allocation20_spill] sm:$0xff] %v3099_v55  ;;  %v3109_v57 = vld [vmem:[%s2892_s27 + $0x122] sm:$0xff]  ;;  %v280_v59 = vld [vmem:[%s2892_s27 + $0x13a] sm:$0xff] }
  0x32   : > { %4474 = vst [vmem:[#allocation21_spill] sm:$0xff] %v3106_v56  ;;  %4475 = vst [vmem:[#allocation22_spill] sm:$0xff] %v3109_v57  ;;  %v281_v58 = vld [vmem:[%s2892_s27 + $0x142] sm:$0xff]  ;;  %v283_v62 = vld [vmem:[%s2892_s27 + $0x15a] sm:$0xff] }
  0x33   : > { %v282_v63 = vld [vmem:[%s2892_s27 + $0x152] sm:$0xff] }
  0x34   : > { %542 = vrot.lane.b32.xlu1 %v2949_v12, %s2807_s28  ;;  %540 = vrot.lane.b32.xlu0 %v2952_v13, %s2807_s28 }
  0x38   : > { %546 = vrot.lane.b32.xlu1 %v237_v14, %s2807_s28  ;;  %544 = vrot.lane.b32.xlu0 %v236_v15, %s2807_s28  ;;  %v285_v14 = vld [vmem:[%s2892_s27 + $0x172] sm:$0xff]  ;;  %v284_v15 = vld [vmem:[%s2892_s27 + $0x16a] sm:$0xff] }
  0x3c   : > { %550 = vrot.lane.b32.xlu1 %v239_v16, %s2807_s28  ;;  %548 = vrot.lane.b32.xlu0 %v238_v17, %s2807_s28 }
  0x40   : > { %554 = vrot.lane.b32.xlu1 %v2967_v18, %s2807_s28  ;;  %552 = vrot.lane.b32.xlu0 %v2970_v19, %s2807_s28 }
  0x44   : > { %558 = vrot.lane.b32.xlu1 %v2977_v20, %s2807_s28  ;;  %556 = vrot.lane.b32.xlu0 %v2980_v21, %s2807_s28 }
  0x48   : > { %562 = vrot.lane.b32.xlu1 %v2987_v22, %s2807_s28  ;;  %560 = vrot.lane.b32.xlu0 %v2990_v23, %s2807_s28  ;;  %v220_v22 = vld [vmem:[%s2892_s27 + $0x168] sm:$0xff] }
  0x4c   : > { %566 = vrot.lane.b32.xlu1 %v247_v24, %s2807_s28  ;;  %564 = vrot.lane.b32.xlu0 %v2998_v25, %s2807_s28 }
  0x50   : > { %570 = vrot.lane.b32.xlu1 %v249_v26, %s2807_s28  ;;  %568 = vrot.lane.b32.xlu0 %v248_v27, %s2807_s28  ;;  %v3144_v27 = vld [vmem:[%s2892_s27 + $0x18] sm:$0xff] }
  0x51   : > { %4480 = vst [vmem:[#allocation27_spill] sm:$0xff] %v3144_v27 }
  0x54   : > { %574 = vrot.lane.b32.xlu1 %v251_v28, %s2807_s28  ;;  %572 = vrot.lane.b32.xlu0 %v250_v29, %s2807_s28  ;;  %v3147_v28 = vld [vmem:[%s2892_s27 + $0x20] sm:$0xff] }
  0x55   : > { %4481 = vst [vmem:[#allocation28_spill] sm:$0xff] %v3147_v28 }
  0x58   : > { %578 = vrot.lane.b32.xlu1 %v253_v30, %s2807_s28  ;;  %576 = vrot.lane.b32.xlu0 %v252_v31, %s2807_s28  ;;  %v3158_v31 = vld [vmem:[%s2892_s27 + $0x38] sm:$0xff] }
  0x5c   : > { %646 = vrot.lane.b32.xlu1 %v255_v32, %s2808_s29  ;;  %644 = vrot.lane.b32.xlu0 %v254_v33, %s2808_s29  ;;  %v3161_v32 = vld [vmem:[%s2892_s27 + $0x30] sm:$0xff] }
  0x60   : > { %650 = vrot.lane.b32.xlu1 %v3020_v34, %s2808_s29  ;;  %648 = vrot.lane.b32.xlu0 %v3023_v35, %s2808_s29 }
  0x64   : > { %654 = vrot.lane.b32.xlu1 %v3030_v36, %s2808_s29  ;;  %652 = vrot.lane.b32.xlu0 %v3033_v37, %s2808_s29  ;;  %v3302_v36 = vld [vmem:[%s2892_s27 + $0x140] sm:$0xff] }
  0x68   : > { %658 = vrot.lane.b32.xlu1 %v3040_v38, %s2808_s29  ;;  %656 = vrot.lane.b32.xlu0 %v3043_v39, %s2808_s29  ;;  %v3290_v38 = vld [vmem:[%s2892_s27 + $0x128] sm:$0xff] }
  0x6c   : > { %662 = vrot.lane.b32.xlu1 %v3050_v40, %s2808_s29  ;;  %660 = vrot.lane.b32.xlu0 %v3053_v41, %s2808_s29  ;;  %v3237_v40 = vld [vmem:[%s2892_s27 + $0xc0] sm:$0xff] }
  0x6d   : > { %4487 = vst [vmem:[#allocation34_spill] sm:$0xff] %v3237_v40 }
  0x70   : > { %666 = vrot.lane.b32.xlu1 %v265_v42, %s2808_s29  ;;  %664 = vrot.lane.b32.xlu0 %v264_v43, %s2808_s29  ;;  %v3172_v43 = vld [vmem:[%s2892_s27 + $0x50] sm:$0xff] }
  0x74   : > { %670 = vrot.lane.b32.xlu1 %v267_v44, %s2808_s29  ;;  %668 = vrot.lane.b32.xlu0 %v266_v45, %s2808_s29  ;;  %v3175_v44 = vld [vmem:[%s2892_s27 + $0x48] sm:$0xff]  ;;  %v203_v45 = vld [vmem:[%s2892_s27 + $0x98] sm:$0xff] }
  0x78   : > { %674 = vrot.lane.b32.xlu1 %v269_v46, %s2808_s29  ;;  %672 = vrot.lane.b32.xlu0 %v268_v47, %s2808_s29  ;;  %v202_v46 = vld [vmem:[%s2892_s27 + $0x90] sm:$0xff] }
  0x7c   : > { %678 = vrot.lane.b32.xlu1 %v271_v48, %s2808_s29  ;;  %676 = vrot.lane.b32.xlu0 %v270_v49, %s2808_s29  ;;  %v3184_v49 = vld [vmem:[%s2892_s27 + $0x68] sm:$0xff] }
  0x80   : > { %682 = vrot.lane.b32.xlu1 %v3076_v50, %s2808_s29  ;;  %680 = vrot.lane.b32.xlu0 %v3079_v51, %s2808_s29 }
  0x84   : > { %686 = vrot.lane.b32.xlu1 %v3086_v52, %s2808_s29  ;;  %684 = vrot.lane.b32.xlu0 %v3089_v53, %s2808_s29  ;;  %v3305_v52 = vld [vmem:[%s2892_s27 + $0x138] sm:$0xff] }
  0x88   : > { %690 = vrot.lane.b32.xlu1 %v3096_v54, %s2808_s29  ;;  %688 = vrot.lane.b32.xlu0 %v3099_v55, %s2808_s29  ;;  %v3293_v54 = vld [vmem:[%s2892_s27 + $0x120] sm:$0xff]  ;;  %v221_v55 = vld [vmem:[%s2892_s27 + $0x170] sm:$0xff] }
  0x8c   : > { %694 = vrot.lane.b32.xlu1 %v3106_v56, %s2808_s29  ;;  %692 = vrot.lane.b32.xlu0 %v3109_v57, %s2808_s29  ;;  %v3276_v56 = vld [vmem:[%s2892_s27 + $0x110] sm:$0xff]  ;;  %v3279_v57 = vld [vmem:[%s2892_s27 + $0x108] sm:$0xff] }
  0x8e   : > { %v3117_v60 = vpop.permute.xlu1 %520  ;;  %v3119_v61 = vpop.permute.xlu0 %516 }
  0x8f   : > { %4476 = vst [vmem:[#allocation23_spill] sm:$0xff] %v3117_v60  ;;  %4477 = vst [vmem:[#allocation24_spill] sm:$0xff] %v3119_v61 }
  0x90   : > { %698 = vrot.lane.b32.xlu1 %v281_v58, %s2808_s29  ;;  %696 = vrot.lane.b32.xlu0 %v280_v59, %s2808_s29  ;;  %v3187_v58 = vld [vmem:[%s2892_s27 + $0x60] sm:$0xff] }
  0x92   : > { %v3125_v1 = vpop.permute.xlu1 %522  ;;  %v3127_v3 = vpop.permute.xlu0 %518 }
  0x93   : > { %4478 = vst [vmem:[#allocation25_spill] sm:$0xff] %v3125_v1  ;;  %4479 = vst [vmem:[#allocation26_spill] sm:$0xff] %v3127_v3  ;;  %v3202_v1 = vld [vmem:[%s2892_s27 + $0x80] sm:$0xff] }
  0x94   : > { %702 = vrot.lane.b32.xlu1 %v283_v62, %s2808_s29  ;;  %700 = vrot.lane.b32.xlu0 %v282_v63, %s2808_s29  ;;  %v205_v63 = vld [vmem:[%s2892_s27 + $0xb0] sm:$0xff] }
  0x96   : > { %v3133_v16 = vpop.permute.xlu1 %526  ;;  %v3135_v17 = vpop.permute.xlu0 %524 }
  0x98   : > { %706 = vrot.lane.b32.xlu1 %v285_v14, %s2808_s29  ;;  %704 = vrot.lane.b32.xlu0 %v284_v15, %s2808_s29  ;;  %v204_v14 = vld [vmem:[%s2892_s27 + $0xa8] sm:$0xff] }
  0x9a   : > { %v3139_v24 = vpop.permute.xlu1 %530  ;;  %v3141_v26 = vpop.permute.xlu0 %528 }
  0x9c   : > { %774 = vrot.lane.b32.xlu1 %v3147_v28, %s2809_s30  ;;  %772 = vrot.lane.b32.xlu0 %v3144_v27, %s2809_s30  ;;  %v3205_v27 = vld [vmem:[%s2892_s27 + $0x78] sm:$0xff] }
  0x9e   : > { %v3153_v29 = vpop.permute.xlu1 %534  ;;  %v3155_v30 = vpop.permute.xlu0 %532 }
  0xa0   : > { %778 = vrot.lane.b32.xlu1 %v3158_v31, %s2809_s30  ;;  %776 = vrot.lane.b32.xlu0 %v3161_v32, %s2809_s30 }
  0xa2   : > { %v3167_v33 = vpop.permute.xlu1 %538  ;;  %v3169_v42 = vpop.permute.xlu0 %536 }
  0xa4   : > { %782 = vrot.lane.b32.xlu1 %v3172_v43, %s2809_s30  ;;  %780 = vrot.lane.b32.xlu0 %v3175_v44, %s2809_s30 }
  0xa6   : > { %v543_v47 = vpop.permute.xlu1 %542  ;;  %v541_v48 = vpop.permute.xlu0 %540 }
  0xa7   : > { %v3190_v59 = vsel %vm1508_vm0, %v203_v45, %v543_v47  ;;  %v3193_v62 = vsel %vm1508_vm0, %v202_v46, %v541_v48 }
  0xa8   : > { %786 = vrot.lane.b32.xlu1 %v3184_v49, %s2809_s30  ;;  %784 = vrot.lane.b32.xlu0 %v3187_v58, %s2809_s30 }
  0xaa   : > { %v547_v15 = vpop.permute.xlu1 %546  ;;  %v545_v28 = vpop.permute.xlu0 %544 }
  0xab   : > { %v3208_v47 = vsel %vm1508_vm0, %v205_v63, %v547_v15  ;;  %v3211_v48 = vsel %vm1508_vm0, %v204_v14, %v545_v28 }
  0xac   : > { %790 = vrot.lane.b32.xlu1 %v3202_v1, %s2809_s30  ;;  %788 = vrot.lane.b32.xlu0 %v3205_v27, %s2809_s30 }
  0xae   : > { %v3217_v60 = vpop.permute.xlu1 %550  ;;  %v3219_v3 = vpop.permute.xlu0 %548 }
  0xaf   : > { %4482 = vst [vmem:[#allocation29_spill] sm:$0xff] %v3217_v60  ;;  %4483 = vst [vmem:[#allocation30_spill] sm:$0xff] %v3219_v3  ;;  %v3234_v3 = vld [vmem:[%s2892_s27 + $0xc8] sm:$0xff] }
  0xb0   : > { %794 = vrot.lane.b32.xlu1 %v203_v45, %s2809_s30  ;;  %792 = vrot.lane.b32.xlu0 %v202_v46, %s2809_s30  ;;  %4486 = vst [vmem:[#allocation33_spill] sm:$0xff] %v3234_v3 }
  0xb2   : > { %v3223_v15 = vpop.permute.xlu1 %554  ;;  %v3225_v28 = vpop.permute.xlu0 %552 }
  0xb3   : > { %4484 = vst [vmem:[#allocation31_spill] sm:$0xff] %v3223_v15  ;;  %4485 = vst [vmem:[#allocation32_spill] sm:$0xff] %v3225_v28 }
  0xb4   : > { %798 = vrot.lane.b32.xlu1 %v205_v63, %s2809_s30  ;;  %796 = vrot.lane.b32.xlu0 %v204_v14, %s2809_s30  ;;  %v3248_v63 = vld [vmem:[%s2892_s27 + $0xe0] sm:$0xff]  ;;  %v3251_v14 = vld [vmem:[%s2892_s27 + $0xd8] sm:$0xff] }
  0xb5   : > { %4488 = vst [vmem:[#allocation35_spill] sm:$0xff] %v3248_v63  ;;  %4489 = vst [vmem:[#allocation36_spill] sm:$0xff] %v3251_v14 }
  0xb6   : > { %v3229_v61 = vpop.permute.xlu1 %558  ;;  %v3231_v60 = vpop.permute.xlu0 %556 }
  0xb8   : > { %802 = vrot.lane.b32.xlu1 %v3234_v3, %s2809_s30  ;;  %800 = vrot.lane.b32.xlu0 %v3237_v40, %s2809_s30  ;;  %v3262_v3 = vld [vmem:[%s2892_s27 + $0xf8] sm:$0xff]  ;;  %v3265_v40 = vld [vmem:[%s2892_s27 + $0xf0] sm:$0xff] }
  0xba   : > { %v3243_v45 = vpop.permute.xlu1 %562  ;;  %v3245_v46 = vpop.permute.xlu0 %560 }
  0xbc   : > { %806 = vrot.lane.b32.xlu1 %v3248_v63, %s2809_s30  ;;  %804 = vrot.lane.b32.xlu0 %v3251_v14, %s2809_s30 }
  0xbe   : > { %v3257_v15 = vpop.permute.xlu1 %566  ;;  %v3259_v28 = vpop.permute.xlu0 %564 }
  0xc0   : > { %810 = vrot.lane.b32.xlu1 %v3262_v3, %s2809_s30  ;;  %808 = vrot.lane.b32.xlu0 %v3265_v40, %s2809_s30 }
  0xc2   : > { %v3271_v63 = vpop.permute.xlu1 %570  ;;  %v3273_v14 = vpop.permute.xlu0 %568 }
  0xc4   : > { %814 = vrot.lane.b32.xlu1 %v3276_v56, %s2809_s30  ;;  %812 = vrot.lane.b32.xlu0 %v3279_v57, %s2809_s30 }
  0xc6   : > { %v3285_v41 = vpop.permute.xlu1 %574  ;;  %v3287_v25 = vpop.permute.xlu0 %572 }
  0xc7   : > { %4490 = vst [vmem:[#allocation37_spill] sm:$0xff] %v3285_v41  ;;  %4491 = vst [vmem:[#allocation38_spill] sm:$0xff] %v3287_v25  ;;  %v3322_v25 = vld [vmem:[%s2892_s27 + $0x158] sm:$0xff]  ;;  %v3325_v41 = vld [vmem:[%s2892_s27 + $0x150] sm:$0xff] }
  0xc8   : > { %818 = vrot.lane.b32.xlu1 %v3290_v38, %s2809_s30  ;;  %816 = vrot.lane.b32.xlu0 %v3293_v54, %s2809_s30  ;;  %4496 = vst [vmem:[#allocation43_spill] sm:$0xff] %v3322_v25  ;;  %4497 = vst [vmem:[#allocation44_spill] sm:$0xff] %v3325_v41 }
  0xca   : > { %v579_v39 = vpop.permute.xlu1 %578  ;;  %v577_v23 = vpop.permute.xlu0 %576 }
  0xcb   : > { %v3308_v53 = vsel %vm1508_vm0, %v221_v55, %v579_v39  ;;  %v3311_v20 = vsel %vm1508_vm0, %v220_v22, %v577_v23 }
  0xcc   : > { %4492 = vst [vmem:[#allocation39_spill] sm:$0xff] %v3308_v53  ;;  %4493 = vst [vmem:[#allocation40_spill] sm:$0xff] %v3311_v20  ;;  %822 = vrot.lane.b32.xlu1 %v3302_v36, %s2809_s30  ;;  %820 = vrot.lane.b32.xlu0 %v3305_v52, %s2809_s30  ;;  %v1514_v20 = vsel %vm1508_vm0, %v3158_v31, %v3133_v16  ;;  %v1513_v53 = vsel %vm1508_vm0, %v3161_v32, %v3135_v17 }
  0xcd   : > { %v1515_v16 = vsel %vm1508_vm0, %v3175_v44, %v3141_v26 }
  0xce   : > { %v3317_v37 = vpop.permute.xlu1 %646  ;;  %v3319_v21 = vpop.permute.xlu0 %644 }
  0xcf   : > { %4494 = vst [vmem:[#allocation41_spill] sm:$0xff] %v3317_v37  ;;  %4495 = vst [vmem:[#allocation42_spill] sm:$0xff] %v3319_v21  ;;  %v2359_v37 = vld [vmem:[%s2892_s27 + $0x188] sm:$0xff]  ;;  %v2358_v21 = vld [vmem:[%s2892_s27 + $0x180] sm:$0xff] }
  0xd0   : > { %826 = vrot.lane.b32.xlu1 %v3322_v25, %s2809_s30  ;;  %824 = vrot.lane.b32.xlu0 %v3325_v41, %s2809_s30 }
  0xd2   : > { %v3331_v23 = vpop.permute.xlu1 %650  ;;  %v3333_v39 = vpop.permute.xlu0 %648 }
  0xd3   : > { %4498 = vst [vmem:[#allocation45_spill] sm:$0xff] %v3331_v23  ;;  %4499 = vst [vmem:[#allocation46_spill] sm:$0xff] %v3333_v39 }
  0xd4   : > { %830 = vrot.lane.b32.xlu1 %v221_v55, %s2809_s30  ;;  %828 = vrot.lane.b32.xlu0 %v220_v22, %s2809_s30  ;;  %v1516_v22 = vsel %vm1508_vm0, %v3172_v43, %v3139_v24 }
  0xd6   : > { %v655_v41 = vpop.permute.xlu1 %654  ;;  %v653_v25 = vpop.permute.xlu0 %652 }
  0xd7   : > { %v3346_v23 = vsel %vm1541_vm1, %v1514_v20, %v655_v41  ;;  %v3349_v55 = vsel %vm1541_vm1, %v1513_v53, %v653_v25 }
  0xd8   : > { %834 = vrot.lane.b32.xlu1 %v2359_v37, %s2809_s30  ;;  %832 = vrot.lane.b32.xlu0 %v2358_v21, %s2809_s30  ;;  %v1518_v21 = vsel %vm1508_vm0, %v3184_v49, %v3153_v29  ;;  %v1517_v37 = vsel %vm1508_vm0, %v3187_v58, %v3155_v30 }
  0xda   : > { %v659_v17 = vpop.permute.xlu1 %658  ;;  %v657_v39 = vpop.permute.xlu0 %656 }
  0xdb   : > { %v3360_v20 = vsel %vm1541_vm1, %v1516_v22, %v659_v17  ;;  %v3363_v25 = vsel %vm1541_vm1, %v1515_v16, %v657_v39 }
  0xdc   : > { %902 = vrot.lane.b32.xlu1 %v2902_v2, %s2810_s3  ;;  %900 = vrot.lane.b32.xlu0 %v2895_v0, %s2810_s3  ;;  %v1520_v0 = vsel %vm1508_vm0, %v3202_v1, %v3167_v33  ;;  %v1519_v2 = vsel %vm1508_vm0, %v3205_v27, %v3169_v42 }
  0xde   : > { %v663_v41 = vpop.permute.xlu1 %662  ;;  %v661_v53 = vpop.permute.xlu0 %660 }
  0xdf   : > { %v3376_v24 = vsel %vm1541_vm1, %v1518_v21, %v663_v41  ;;  %v3379_v26 = vsel %vm1541_vm1, %v1517_v37, %v661_v53 }
  0xe0   : > { %906 = vrot.lane.b32.xlu1 %v2909_v4, %s2810_s3  ;;  %904 = vrot.lane.b32.xlu0 %v2912_v5, %s2810_s3 }
  0xe2   : > { %v667_v29 = vpop.permute.xlu1 %666  ;;  %v665_v30 = vpop.permute.xlu0 %664 }
  0xe3   : > { %v3392_v39 = vsel %vm1541_vm1, %v1520_v0, %v667_v29  ;;  %v3395_v22 = vsel %vm1541_vm1, %v1519_v2, %v665_v30 }
  0xe4   : > { %910 = vrot.lane.b32.xlu1 %v2919_v6, %s2810_s3  ;;  %908 = vrot.lane.b32.xlu0 %v2922_v7, %s2810_s3 }
  0xe6   : > { %v671_v16 = vpop.permute.xlu1 %670  ;;  %v669_v33 = vpop.permute.xlu0 %668 }
  0xe7   : > { %v3403_v17 = vsel %vm1541_vm1, %v3190_v59, %v671_v16  ;;  %v3407_v42 = vsel %vm1541_vm1, %v3193_v62, %v669_v33 }
  0xe8   : > { %914 = vrot.lane.b32.xlu1 %v2929_v8, %s2810_s3  ;;  %912 = vrot.lane.b32.xlu0 %v2932_v9, %s2810_s3 }
  0xea   : > { %v675_v21 = vpop.permute.xlu1 %674  ;;  %v673_v37 = vpop.permute.xlu0 %672 }
  0xeb   : > { %v3415_v41 = vsel %vm1541_vm1, %v3208_v47, %v675_v21  ;;  %v3419_v59 = vsel %vm1541_vm1, %v3211_v48, %v673_v37  ;;  %v4502_v21 = vld [vmem:[#allocation38_spill] sm:$0xff] }
  0xec   : > { %918 = vrot.lane.b32.xlu1 %v2939_v10, %s2810_s3  ;;  %916 = vrot.lane.b32.xlu0 %v2942_v11, %s2810_s3  ;;  %v1530_v10 = vsel %vm1508_vm0, %v3262_v3, %v3229_v61  ;;  %v1529_v11 = vsel %vm1508_vm0, %v3265_v40, %v3231_v60 }
  0xee   : > { %v3425_v8 = vpop.permute.xlu1 %678  ;;  %v3427_v62 = vpop.permute.xlu0 %676 }
  0xf0   : > { %922 = vrot.lane.b32.xlu1 %v2949_v12, %s2810_s3  ;;  %920 = vrot.lane.b32.xlu0 %v2952_v13, %s2810_s3 }
  0xf2   : > { %v3433_v9 = vpop.permute.xlu1 %682  ;;  %v3435_v47 = vpop.permute.xlu0 %680 }
  0xf4   : > { %934 = vrot.lane.b32.xlu1 %v2967_v18, %s2810_s3  ;;  %932 = vrot.lane.b32.xlu0 %v2970_v19, %s2810_s3  ;;  %v1532_v18 = vsel %vm1508_vm0, %v3276_v56, %v3243_v45  ;;  %v1531_v19 = vsel %vm1508_vm0, %v3279_v57, %v3245_v46 }
  0xf6   : > { %v687_v12 = vpop.permute.xlu1 %686  ;;  %v685_v13 = vpop.permute.xlu0 %684 }
  0xf7   : > { %v3448_v48 = vsel %vm1541_vm1, %v1530_v10, %v687_v12  ;;  %v3451_v53 = vsel %vm1541_vm1, %v1529_v11, %v685_v13 }
  0xf8   : > { %1060 = vrot.lane.b32.xlu1 %v3079_v51, %s2811_s4  ;;  %1028 = vrot.lane.b32.xlu0 %v3023_v35, %s2811_s4  ;;  %v1534_v35 = vsel %vm1508_vm0, %v3290_v38, %v3257_v15  ;;  %v1533_v51 = vsel %vm1508_vm0, %v3293_v54, %v3259_v28 }
  0xfa   : > { %v691_v60 = vpop.permute.xlu1 %690  ;;  %v689_v61 = vpop.permute.xlu0 %688 }
  0xfb   : > { %v3464_v0 = vsel %vm1541_vm1, %v1532_v18, %v691_v60  ;;  %v3467_v2 = vsel %vm1541_vm1, %v1531_v19, %v689_v61  ;;  %v4505_v19 = vld [vmem:[#allocation39_spill] sm:$0xff]  ;;  %v4506_v61 = vld [vmem:[#allocation40_spill] sm:$0xff] }
  0xfc   : > { %1062 = vrot.lane.b32.xlu1 %v3076_v50, %s2811_s4  ;;  %1030 = vrot.lane.b32.xlu0 %v3020_v34, %s2811_s4  ;;  %v1536_v34 = vsel %vm1508_vm0, %v3302_v36, %v3271_v63  ;;  %v1535_v50 = vsel %vm1508_vm0, %v3305_v52, %v3273_v14  ;;  %v4503_v14 = vld [vmem:[#allocation44_spill] sm:$0xff] }
  0xfd   : > { %v1537_v37 = vsel %vm1508_vm0, %v4503_v14, %v4502_v21 }
  0xfe   : > { %v695_v45 = vpop.permute.xlu1 %694  ;;  %v693_v46 = vpop.permute.xlu0 %692 }
  0xff   : > { %v3480_v29 = vsel %vm1541_vm1, %v1534_v35, %v695_v45  ;;  %v3483_v30 = vsel %vm1541_vm1, %v1533_v51, %v693_v46  ;;  %v4507_v46 = vld [vmem:[#allocation12_spill] sm:$0xff] }
 0x100   : > { %1188 = vrot.lane.b32.xlu1 %v3265_v40, %s2812_s5  ;;  %1156 = vrot.lane.b32.xlu0 %v3161_v32, %s2812_s5  ;;  %v4500_v40 = vld [vmem:[#allocation37_spill] sm:$0xff]  ;;  %v4501_v32 = vld [vmem:[#allocation43_spill] sm:$0xff] }
 0x101   : > { %v1538_v63 = vsel %vm1508_vm0, %v4501_v32, %v4500_v40  ;;  %v1838_v40 = vld [vmem:[%s4412_s1 + $0x8] sm:$0xff] }
 0x102   : > { %v699_v15 = vpop.permute.xlu1 %698  ;;  %v697_v28 = vpop.permute.xlu0 %696 }
 0x103   : > { %v3496_v16 = vsel %vm1541_vm1, %v1536_v34, %v699_v15  ;;  %v3499_v33 = vsel %vm1541_vm1, %v1535_v50, %v697_v28  ;;  %v1840_v34 = vld [vmem:[%s4412_s1 + $0x18] sm:$0xff]  ;;  %v1839_v50 = vld [vmem:[%s4412_s1 + $0x10] sm:$0xff] }
 0x104   : > { %1190 = vrot.lane.b32.xlu1 %v3262_v3, %s2812_s5  ;;  %1158 = vrot.lane.b32.xlu0 %v3158_v31, %s2812_s5  ;;  %v4504_v3 = vld [vmem:[#allocation7_spill] sm:$0xff] }
 0x106   : > { %v703_v10 = vpop.permute.xlu1 %702  ;;  %v701_v11 = vpop.permute.xlu0 %700 }
 0x107   : > { %v3512_v12 = vsel %vm1541_vm1, %v1538_v63, %v703_v10  ;;  %v3515_v13 = vsel %vm1541_vm1, %v1537_v37, %v701_v11  ;;  %v4509_v63 = vld [vmem:[#allocation18_spill] sm:$0xff] }
 0x108   : > { %1316 = vrot.lane.b32.xlu1 %v4504_v3, %s2813_s6  ;;  %1284 = vrot.lane.b32.xlu0 %v2912_v5, %s2813_s6  ;;  %v1841_v5 = vld [vmem:[%s4412_s1 + $0x20] sm:$0xf] }
 0x109   : > { %2596 = vmatprep.subr.msk.mxu0 %vm1939_vm2, %v1841_v5  ;;  %2654 = vmatprep.subr.msk.mxu1 %vm1939_vm2, %v1841_v5  ;;  %v1837_v10 = vld [vmem:[%s4412_s1] sm:$0xff] }
 0x10a   : > { %v707_v31 = vpop.permute.xlu1 %706  ;;  %v705_v18 = vpop.permute.xlu0 %704  ;;  %2597 = vmatpush3.msk.msra.mxu0 %vm1939_vm2, %v1841_v5  ;;  %2659 = vmatpush3.msk.msra.mxu1 %vm1939_vm2, %v1841_v5 }
 0x10b   : > { %v3523_v60 = vsel %vm1541_vm1, %v4505_v19, %v707_v31  ;;  %v3527_v35 = vsel %vm1541_vm1, %v4506_v61, %v705_v18  ;;  %2598 = vmatprep.subr.mxu0 %v1840_v34  ;;  %2655 = vmatprep.subr.mxu1 %v1840_v34  ;;  %v4510_v19 = vld [vmem:[#allocation17_spill] sm:$0xff]  ;;  %v4511_v61 = vld [vmem:[#allocation11_spill] sm:$0xff] }
 0x10c   : > { %1286 = vrot.lane.b32.xlu1 %v2909_v4, %s2813_s6  ;;  %936 = vrot.lane.b32.xlu0 %v4504_v3, %s2810_s3  ;;  %v4508_v4 = vld [vmem:[#allocation6_spill] sm:$0xff] }
 0x10d   : > { %2599 = vmatpush3.msra.mxu0 %v1840_v34  ;;  %2660 = vmatpush3.msra.mxu1 %v1840_v34 }
 0x10e   : > { %v3536_v51 = vpop.permute.xlu1 %774  ;;  %v3538_v45 = vpop.permute.xlu0 %772  ;;  %2600 = vmatprep.subr.mxu0 %v1839_v50  ;;  %2656 = vmatprep.subr.mxu1 %v1839_v50 }
 0x10f   : > { %2601 = vmatpush3.msra.mxu0 %v1839_v50  ;;  %2661 = vmatpush3.msra.mxu1 %v1839_v50 }
 0x110   : > { %1412 = vrot.lane.b32.xlu1 %v4507_v46, %s2814_s15  ;;  %1318 = vrot.lane.b32.xlu0 %v4508_v4, %s2813_s6 }
 0x111   : > { %2602 = vmatprep.subr.mxu0 %v1838_v40  ;;  %2657 = vmatprep.subr.mxu1 %v1838_v40 }
 0x112   : > { %v3550_v15 = vpop.permute.xlu1 %778  ;;  %v3552_v28 = vpop.permute.xlu0 %776  ;;  %2603 = vmatpush3.msra.mxu0 %v1838_v40  ;;  %2662 = vmatpush3.msra.mxu1 %v1838_v40 }
 0x113   : > { %2604 = vmatprep.subr.mxu0 %v1837_v10  ;;  %2658 = vmatprep.subr.mxu1 %v1837_v10 }
 0x114   : > { %938 = vrot.lane.b32.xlu1 %v4508_v4, %s2810_s3  ;;  %1444 = vrot.lane.b32.xlu0 %v4509_v63, %s2814_s15 }
 0x115   : > { %2605 = vmatpush3.msra.mxu0 %v1837_v10  ;;  %2663 = vmatpush3.msra.mxu1 %v1837_v10 }
 0x116   : > { %v783_v21 = vpop.permute.xlu1 %782  ;;  %v781_v37 = vpop.permute.xlu0 %780 }
 0x117   : > { %v3566_v11 = vsel %vm1574_vm3, %v3346_v23, %v783_v21  ;;  %v3570_v3 = vsel %vm1574_vm3, %v3349_v55, %v781_v37  ;;  %v4517_v21 = vld [vmem:[#allocation9_spill] sm:$0xff]  ;;  %v4519_v37 = vld [vmem:[#allocation8_spill] sm:$0xff] }
 0x118   : > { %1064 = vrot.lane.b32.xlu1 %v4509_v63, %s2811_s4  ;;  %1032 = vrot.lane.b32.xlu0 %v4507_v46, %s2811_s4 }
 0x11a   : > { %v787_v31 = vpop.permute.xlu1 %786  ;;  %v785_v18 = vpop.permute.xlu0 %784 }
 0x11b   : > { %v3578_v23 = vsel %vm1574_vm3, %v3360_v20, %v787_v31  ;;  %v3582_v55 = vsel %vm1574_vm3, %v3363_v25, %v785_v18  ;;  %v4520_v18 = vld [vmem:[#allocation20_spill] sm:$0xff] }
 0x11c   : > { %1446 = vrot.lane.b32.xlu1 %v4510_v19, %s2814_s15  ;;  %1414 = vrot.lane.b32.xlu0 %v4511_v61, %s2814_s15 }
 0x11e   : > { %v791_v5 = vpop.permute.xlu1 %790  ;;  %v789_v46 = vpop.permute.xlu0 %788 }
 0x11f   : > { %v3590_v4 = vsel %vm1574_vm3, %v3376_v24, %v791_v5  ;;  %v3594_v20 = vsel %vm1574_vm3, %v3379_v26, %v789_v46 }
 0x120   : > { %1066 = vrot.lane.b32.xlu1 %v4510_v19, %s2811_s4  ;;  %1034 = vrot.lane.b32.xlu0 %v4511_v61, %s2811_s4 }
 0x122   : > { %v795_v25 = vpop.permute.xlu1 %794  ;;  %v793_v34 = vpop.permute.xlu0 %792 }
 0x123   : > { %v3602_v50 = vsel %vm1574_vm3, %v3392_v39, %v795_v25  ;;  %v3606_v24 = vsel %vm1574_vm3, %v3395_v22, %v793_v34  ;;  %v4521_v34 = vld [vmem:[#allocation19_spill] sm:$0xff] }
 0x124   : > { %4512 = vst [vmem:[#allocation37_spill] sm:$0xff] %v3602_v50  ;;  %1192 = vrot.lane.b32.xlu1 %v3279_v57, %s2812_s5  ;;  %1160 = vrot.lane.b32.xlu0 %v3175_v44, %s2812_s5  ;;  %v4538_v50 = vld [vmem:[#allocation34_spill] sm:$0xff] }
 0x126   : > { %v799_v26 = vpop.permute.xlu1 %798  ;;  %v797_v40 = vpop.permute.xlu0 %796 }
 0x127   : > { %v3614_v63 = vsel %vm1574_vm3, %v3403_v17, %v799_v26  ;;  %v3618_v39 = vsel %vm1574_vm3, %v3407_v42, %v797_v40 }
 0x128   : > { %4513 = vst [vmem:[#allocation43_spill] sm:$0xff] %v3614_v63  ;;  %4514 = vst [vmem:[#allocation38_spill] sm:$0xff] %v3618_v39  ;;  %1194 = vrot.lane.b32.xlu1 %v3276_v56, %s2812_s5  ;;  %1162 = vrot.lane.b32.xlu0 %v3172_v43, %s2812_s5  ;;  %v4535_v63 = vld [vmem:[#allocation24_spill] sm:$0xff] }
 0x12a   : > { %v803_v57 = vpop.permute.xlu1 %802  ;;  %v801_v22 = vpop.permute.xlu0 %800 }
 0x12b   : > { %v3626_v44 = vsel %vm1574_vm3, %v3415_v41, %v803_v57  ;;  %v3630_v17 = vsel %vm1574_vm3, %v3419_v59, %v801_v22  ;;  %v4518_v59 = vld [vmem:[#allocation14_spill] sm:$0xff] }
 0x12c   : > { %4515 = vst [vmem:[#allocation44_spill] sm:$0xff] %v3626_v44  ;;  %4516 = vst [vmem:[#allocation7_spill] sm:$0xff] %v3630_v17  ;;  %1320 = vrot.lane.b32.xlu1 %v4517_v21, %s2813_s6  ;;  %1288 = vrot.lane.b32.xlu0 %v2922_v7, %s2813_s6 }
 0x12e   : > { %v3636_v56 = vpop.permute.xlu1 %806  ;;  %v3638_v42 = vpop.permute.xlu0 %804 }
 0x130   : > { %1290 = vrot.lane.b32.xlu1 %v2919_v6, %s2813_s6  ;;  %940 = vrot.lane.b32.xlu0 %v4517_v21, %s2810_s3 }
 0x132   : > { %v3644_v43 = vpop.permute.xlu1 %810  ;;  %v3646_v41 = vpop.permute.xlu0 %808 }
 0x134   : > { %1416 = vrot.lane.b32.xlu1 %v4518_v59, %s2814_s15  ;;  %1322 = vrot.lane.b32.xlu0 %v4519_v37, %s2813_s6 }
 0x136   : > { %v815_v7 = vpop.permute.xlu1 %814  ;;  %v813_v10 = vpop.permute.xlu0 %812 }
 0x137   : > { %v3654_v31 = vsel %vm1574_vm3, %v3448_v48, %v815_v7  ;;  %v3658_v6 = vsel %vm1574_vm3, %v3451_v53, %v813_v10  ;;  %v4529_v7 = vld [vmem:[#allocation10_spill] sm:$0xff] }
 0x138   : > { %942 = vrot.lane.b32.xlu1 %v4519_v37, %s2810_s3  ;;  %1448 = vrot.lane.b32.xlu0 %v4520_v18, %s2814_s15 }
 0x13a   : > { %v819_v19 = vpop.permute.xlu1 %818  ;;  %v817_v61 = vpop.permute.xlu0 %816 }
 0x13b   : > { %v3666_v5 = vsel %vm1574_vm3, %v3464_v0, %v819_v19  ;;  %v3670_v48 = vsel %vm1574_vm3, %v3467_v2, %v817_v61  ;;  %v4522_v2 = vld [vmem:[#allocation13_spill] sm:$0xff]  ;;  %v4530_v19 = vld [vmem:[#allocation16_spill] sm:$0xff] }
 0x13c   : > { %1068 = vrot.lane.b32.xlu1 %v4520_v18, %s2811_s4  ;;  %1036 = vrot.lane.b32.xlu0 %v4518_v59, %s2811_s4 }
 0x13e   : > { %v823_v53 = vpop.permute.xlu1 %822  ;;  %v821_v46 = vpop.permute.xlu0 %820 }
 0x13f   : > { %v3678_v25 = vsel %vm1574_vm3, %v3480_v29, %v823_v53  ;;  %v3682_v0 = vsel %vm1574_vm3, %v3483_v30, %v821_v46  ;;  %v4531_v46 = vld [vmem:[#allocation22_spill] sm:$0xff] }
 0x140   : > { %1450 = vrot.lane.b32.xlu1 %v4521_v34, %s2814_s15  ;;  %1418 = vrot.lane.b32.xlu0 %v4522_v2, %s2814_s15 }
 0x142   : > { %v827_v26 = vpop.permute.xlu1 %826  ;;  %v825_v40 = vpop.permute.xlu0 %824 }
 0x143   : > { %v3690_v57 = vsel %vm1574_vm3, %v3496_v16, %v827_v26  ;;  %v3694_v29 = vsel %vm1574_vm3, %v3499_v33, %v825_v40 }
 0x144   : > { %4523 = vst [vmem:[#allocation39_spill] sm:$0xff] %v3690_v57  ;;  %4524 = vst [vmem:[#allocation40_spill] sm:$0xff] %v3694_v29  ;;  %1070 = vrot.lane.b32.xlu1 %v4521_v34, %s2811_s4  ;;  %1038 = vrot.lane.b32.xlu0 %v4522_v2, %s2811_s4 }
 0x146   : > { %v831_v30 = vpop.permute.xlu1 %830  ;;  %v829_v22 = vpop.permute.xlu0 %828 }
 0x147   : > { %v3702_v21 = vsel %vm1574_vm3, %v3512_v12, %v831_v30  ;;  %v3706_v16 = vsel %vm1574_vm3, %v3515_v13, %v829_v22  ;;  %v4533_v30 = vld [vmem:[#allocation21_spill] sm:$0xff]  ;;  %v4534_v22 = vld [vmem:[#allocation15_spill] sm:$0xff] }
 0x148   : > { %4525 = vst [vmem:[#allocation12_spill] sm:$0xff] %v3702_v21  ;;  %4526 = vst [vmem:[#allocation6_spill] sm:$0xff] %v3706_v16  ;;  %1196 = vrot.lane.b32.xlu1 %v3293_v54, %s2812_s5  ;;  %1164 = vrot.lane.b32.xlu0 %v3187_v58, %s2812_s5  ;;  %v2460_v54 = vld [vmem:[%s2892_s27 + $0x61] sm:$0xff] }
 0x14a   : > { %v835_v33 = vpop.permute.xlu1 %834  ;;  %v833_v59 = vpop.permute.xlu0 %832 }
 0x14b   : > { %v3714_v37 = vsel %vm1574_vm3, %v3523_v60, %v835_v33  ;;  %v3718_v12 = vsel %vm1574_vm3, %v3527_v35, %v833_v59  ;;  %v2461_v60 = vld [vmem:[%s2892_s27 + $0x69] sm:$0xff] }
 0x14c   : > { %4527 = vst [vmem:[#allocation18_spill] sm:$0xff] %v3714_v37  ;;  %4528 = vst [vmem:[#allocation17_spill] sm:$0xff] %v3718_v12  ;;  %1198 = vrot.lane.b32.xlu1 %v3290_v38, %s2812_s5  ;;  %1166 = vrot.lane.b32.xlu0 %v3184_v49, %s2812_s5  ;;  %v2477_v38 = vld [vmem:[%s2892_s27 + $0x129] sm:$0xff]  ;;  %v2479_v37 = vld [vmem:[%s2892_s27 + $0x141] sm:$0xff] }
 0x14d   : > { %v2399_v33 = vld [vmem:[%s2892_s27 + $0x6a] sm:$0xff] }
 0x14e   : > { %v3725_v13 = vpop.permute.xlu1 %902  ;;  %v3727_v58 = vpop.permute.xlu0 %900 }
 0x150   : > { %1324 = vrot.lane.b32.xlu1 %v4529_v7, %s2813_s6  ;;  %1292 = vrot.lane.b32.xlu0 %v2460_v54, %s2813_s6 }
 0x152   : > { %v3733_v10 = vpop.permute.xlu1 %906  ;;  %v3735_v35 = vpop.permute.xlu0 %904 }
 0x154   : > { %1294 = vrot.lane.b32.xlu1 %v2461_v60, %s2813_s6  ;;  %944 = vrot.lane.b32.xlu0 %v4529_v7, %s2810_s3 }
 0x156   : > { %v3741_v49 = vpop.permute.xlu1 %910  ;;  %v3743_v18 = vpop.permute.xlu0 %908 }
 0x158   : > { %1420 = vrot.lane.b32.xlu1 %v4530_v19, %s2814_s15  ;;  %1326 = vrot.lane.b32.xlu0 %v2477_v38, %s2813_s6 }
 0x15a   : > { %v3748_v61 = vpop.permute.xlu1 %914  ;;  %v3750_v53 = vpop.permute.xlu0 %912 }
 0x15c   : > { %946 = vrot.lane.b32.xlu1 %v2477_v38, %s2810_s3  ;;  %1452 = vrot.lane.b32.xlu0 %v4531_v46, %s2814_s15 }
 0x15e   : > { %v3755_v34 = vpop.permute.xlu1 %918  ;;  %v3757_v2 = vpop.permute.xlu0 %916 }
 0x160   : > { %1072 = vrot.lane.b32.xlu1 %v4531_v46, %s2811_s4  ;;  %1040 = vrot.lane.b32.xlu0 %v4530_v19, %s2811_s4  ;;  %v2478_v46 = vld [vmem:[%s2892_s27 + $0x139] sm:$0xff] }
 0x162   : > { %v3763_v26 = vpop.permute.xlu1 %922  ;;  %v3765_v40 = vpop.permute.xlu0 %920 }
 0x163   : > { %4532 = vst [vmem:[#allocation11_spill] sm:$0xff] %v3763_v26 }
 0x164   : > { %1454 = vrot.lane.b32.xlu1 %v4533_v30, %s2814_s15  ;;  %1422 = vrot.lane.b32.xlu0 %v4534_v22, %s2814_s15 }
 0x166   : > { %v3772_v59 = vpop.permute.xlu1 %934  ;;  %v933_v54 = vpop.permute.xlu0 %932 }
 0x168   : > { %1074 = vrot.lane.b32.xlu1 %v4533_v30, %s2811_s4  ;;  %1042 = vrot.lane.b32.xlu0 %v2399_v33, %s2811_s4  ;;  %v2462_v30 = vld [vmem:[%s2892_s27 + $0x79] sm:$0xff] }
 0x16a   : > { %v1061_v7 = vpop.permute.xlu1 %1060  ;;  %v1029_v60 = vpop.permute.xlu0 %1028 }
 0x16c   : > { %1200 = vrot.lane.b32.xlu1 %v3305_v52, %s2812_s5  ;;  %1168 = vrot.lane.b32.xlu0 %v3205_v27, %s2812_s5  ;;  %v2463_v27 = vld [vmem:[%s2892_s27 + $0x81] sm:$0xff] }
 0x16e   : > { %v3781_v38 = vpop.permute.xlu1 %1062  ;;  %v3783_v19 = vpop.permute.xlu0 %1030 }
 0x170   : > { %1202 = vrot.lane.b32.xlu1 %v3302_v36, %s2812_s5  ;;  %1170 = vrot.lane.b32.xlu0 %v3202_v1, %s2812_s5  ;;  %v190_v36 = vld [vmem:[%s2892_s27] sm:$0xff] }
 0x171   : > { %v2494_v1 = vld [vmem:[%s2892_s27 + $0x7a] sm:$0xff]  ;;  %v1509_v21 = vsel %vm1508_vm0, %v190_v36, %v4535_v63 }
 0x172   : > { %v1189_v22 = vpop.permute.xlu1 %1188  ;;  %v1157_v52 = vpop.permute.xlu0 %1156  ;;  %v4537_v36 = vld [vmem:[#allocation30_spill] sm:$0xff] }
 0x173   : > { %v1525_v26 = vsel %vm1508_vm0, %v4538_v50, %v4537_v36  ;;  %v4539_v36 = vld [vmem:[#allocation26_spill] sm:$0xff] }
 0x174   : > { %1328 = vrot.lane.b32.xlu1 %v2478_v46, %s2813_s6  ;;  %1296 = vrot.lane.b32.xlu0 %v2462_v30, %s2813_s6  ;;  %v4536_v30 = vld [vmem:[#allocation42_spill] sm:$0xff] }
 0x175   : > { %v1542_v39 = vsel %vm1541_vm1, %v1509_v21, %v4536_v30 }
 0x176   : > { %v3794_v33 = vpop.permute.xlu1 %1190  ;;  %v3796_v44 = vpop.permute.xlu0 %1158 }
 0x178   : > { %1298 = vrot.lane.b32.xlu1 %v2463_v27, %s2813_s6  ;;  %948 = vrot.lane.b32.xlu0 %v2478_v46, %s2810_s3  ;;  %v2510_v27 = vld [vmem:[%s2892_s27 + $0x13a] sm:$0xff]  ;;  %v1575_v46 = vsel %vm1574_vm3, %v1542_v39, %v3538_v45  ;;  %v1558_v45 = vsel %vm1541_vm1, %v1525_v26, %v3427_v62  ;;  %v191_v62 = vld [vmem:[%s2892_s27 + $0x8] sm:$0xff] }
 0x179   : > { %v1608_v63 = vsel %vm1607_vm4, %v1575_v46, %v3727_v58  ;;  %v1591_v21 = vsel %vm1574_vm3, %v1558_v45, %v3638_v42  ;;  %v2511_v42 = vld [vmem:[%s2892_s27 + $0x142] sm:$0xff]  ;;  %v4540_v45 = vld [vmem:[#allocation29_spill] sm:$0xff] }
 0x17a   : > { %v1317_v17 = vpop.permute.xlu1 %1316  ;;  %v1285_v12 = vpop.permute.xlu0 %1284  ;;  %v1641_v29 = vsel %vm1640_vm5, %v1608_v63, %v1029_v60  ;;  %v2495_v26 = vld [vmem:[%s2892_s27 + $0x82] sm:$0xff] }
 0x17b   : > { %v1674_v39 = vsel %vm1673_vm6, %v1641_v29, %v1157_v52 }
 0x17c   : > { %1424 = vrot.lane.b32.xlu1 %v2494_v1, %s2814_s15  ;;  %1330 = vrot.lane.b32.xlu0 %v2479_v37, %s2813_s6  ;;  %v1707_v50 = vsel %vm1706_vm7, %v1674_v39, %v1285_v12  ;;  %v4541_v39 = vld [vmem:[#allocation33_spill] sm:$0xff] }
 0x17e   : > { %v1287_v16 = vpop.permute.xlu1 %1286  ;;  %v3812_v57 = vpop.permute.xlu0 %936 }
 0x180   : > { %950 = vrot.lane.b32.xlu1 %v2479_v37, %s2810_s3  ;;  %1456 = vrot.lane.b32.xlu0 %v2510_v27, %s2814_s15  ;;  %v1624_v37 = vsel %vm1607_vm4, %v1591_v21, %v933_v54 }
 0x181   : > { %v1657_v46 = vsel %vm1640_vm5, %v1624_v37, %v1061_v7  ;;  %v1510_v7 = vsel %vm1508_vm0, %v191_v62, %v4539_v36 }
 0x182   : > { %v1413_v58 = vpop.permute.xlu1 %1412  ;;  %v1319_v60 = vpop.permute.xlu0 %1318  ;;  %v1690_v29 = vsel %vm1673_vm6, %v1657_v46, %v1189_v22  ;;  %v4542_v22 = vld [vmem:[#allocation41_spill] sm:$0xff] }
 0x183   : > { %v1740_v30 = vsel %vm1739_vm8, %v1707_v50, %v1413_v58  ;;  %v1723_v12 = vsel %vm1706_vm7, %v1690_v29, %v1317_v17  ;;  %v1543_v17 = vsel %vm1541_vm1, %v1510_v7, %v4542_v22  ;;  %v2496_v22 = vld [vmem:[%s2892_s27 + $0x92] sm:$0xff] }
 0x184   : > { %1773 = vst.msk [vmem:[#allocation2] sm:$0xff] %vm1772_vm9, %v1740_v30  ;;  %1076 = vrot.lane.b32.xlu1 %v2510_v27, %s2811_s4  ;;  %1044 = vrot.lane.b32.xlu0 %v2494_v1, %s2811_s4  ;;  %v1526_v27 = vsel %vm1508_vm0, %v4541_v39, %v4540_v45  ;;  %v1576_v21 = vsel %vm1574_vm3, %v1543_v17, %v3536_v51  ;;  %v2481_v17 = vld [vmem:[%s2892_s27 + $0x159] sm:$0xff] }
 0x185   : > { %v1559_v1 = vsel %vm1541_vm1, %v1526_v27, %v3425_v8  ;;  %v1609_v30 = vsel %vm1607_vm4, %v1576_v21, %v3725_v13  ;;  %v2432_v13 = vld [vmem:[%s2892_s27 + $0x90] sm:$0xff] }
 0x186   : > { %v3839_v52 = vpop.permute.xlu1 %938  ;;  %v1445_v54 = vpop.permute.xlu0 %1444  ;;  %v1592_v50 = vsel %vm1574_vm3, %v1559_v1, %v3636_v56  ;;  %v1642_v8 = vsel %vm1640_vm5, %v1609_v30, %v3783_v19  ;;  %v4544_v30 = vld [vmem:[#allocation27_spill] sm:$0xff] }
 0x187   : > { %v1756_v63 = vsel %vm1739_vm8, %v1723_v12, %v1445_v54  ;;  %v1625_v46 = vsel %vm1607_vm4, %v1592_v50, %v3772_v59  ;;  %v1675_v56 = vsel %vm1673_vm6, %v1642_v8, %v3796_v44  ;;  %v2433_v44 = vld [vmem:[%s2892_s27 + $0x98] sm:$0xff]  ;;  %v4543_v50 = vld [vmem:[#allocation23_spill] sm:$0xff] }
 0x188   : > { %1789 = vst.msk [vmem:[#allocation2 + $0x80] sm:$0xff] %vm1772_vm9, %v1756_v63  ;;  %1458 = vrot.lane.b32.xlu1 %v2511_v42, %s2814_s15  ;;  %1426 = vrot.lane.b32.xlu0 %v2495_v26, %s2814_s15  ;;  %v1658_v29 = vsel %vm1640_vm5, %v1625_v46, %v3781_v38  ;;  %v1708_v59 = vsel %vm1706_vm7, %v1675_v56, %v1287_v16  ;;  %v2480_v54 = vld [vmem:[%s2892_s27 + $0x151] sm:$0xff] }
 0x189   : > { %v1691_v51 = vsel %vm1673_vm6, %v1658_v29, %v3794_v33  ;;  %v2464_v63 = vld [vmem:[%s2892_s27 + $0x91] sm:$0xff]  ;;  %v1511_v46 = vsel %vm1508_vm0, %v4544_v30, %v4543_v50  ;;  %v4550_v30 = vld [vmem:[#allocation31_spill] sm:$0xff] }
 0x18a   : > { %v3858_v58 = vpop.permute.xlu1 %1064  ;;  %v1033_v37 = vpop.permute.xlu0 %1032  ;;  %v1724_v38 = vsel %vm1706_vm7, %v1691_v51, %v1319_v60  ;;  %v2512_v8 = vld [vmem:[%s2892_s27 + $0x152] sm:$0xff] }
 0x18b   : > { %v1805_v62 = vld [vmem:[#allocation2] sm:$0xff]  ;;  %v4549_v50 = vld [vmem:[#allocation28_spill] sm:$0xff] }
 0x18c   : > { %1078 = vrot.lane.b32.xlu1 %v2511_v42, %s2811_s4  ;;  %1046 = vrot.lane.b32.xlu0 %v2495_v26, %s2811_s4 }
 0x18d   : > { %2606 = vmatprep.mubr.msk.f32.mxu0 %vm1772_vm9, %v1805_v62  ;;  %v4545_v62 = vld [vmem:[#allocation46_spill] sm:$0xff] }
 0x18e   : > { %v1447_v19 = vpop.permute.xlu1 %1446  ;;  %v1415_v42 = vpop.permute.xlu0 %1414  ;;  %v1544_v29 = vsel %vm1541_vm1, %v1511_v46, %v4545_v62  ;;  %v4551_v46 = vld [vmem:[#allocation35_spill] sm:$0xff] }
 0x18f   : > { %v1757_v26 = vsel %vm1739_vm8, %v1724_v38, %v1447_v19  ;;  %v1741_v12 = vsel %vm1739_vm8, %v1708_v59, %v1415_v42  ;;  %v1821_v33 = vld [vmem:[#allocation2 + $0x80] sm:$0xff]  ;;  %v1577_v51 = vsel %vm1574_vm3, %v1544_v29, %v3552_v28  ;;  %v4546_v38 = vld [vmem:[#allocation32_spill] sm:$0xff]  ;;  %v1528_v62 = vsel %vm1508_vm0, %v4551_v46, %v4550_v30 }
 0x190   : > { %1790 = vst.msk [vmem:[#allocation2 + $0x88] sm:$0xff] %vm1772_vm9, %v1757_v26  ;;  %1774 = vst.msk [vmem:[#allocation2 + $0x8] sm:$0xff] %vm1772_vm9, %v1741_v12  ;;  %1204 = vrot.lane.b32.xlu1 %v4503_v14, %s2812_s5  ;;  %1172 = vrot.lane.b32.xlu0 %v2432_v13, %s2812_s5  ;;  %v1610_v59 = vsel %vm1607_vm4, %v1577_v51, %v3735_v35  ;;  %v4547_v19 = vld [vmem:[#allocation36_spill] sm:$0xff] }
 0x191   : > { %2630 = vmatprep.mubr.msk.f32.mxu1 %vm1772_vm9, %v1821_v33  ;;  %v1527_v42 = vsel %vm1508_vm0, %v4547_v19, %v4546_v38  ;;  %v1643_v26 = vsel %vm1640_vm5, %v1610_v59, %v1033_v37  ;;  %v2514_v30 = vld [vmem:[%s2892_s27 + $0x16a] sm:$0xff] }
 0x192   : > { %v3887_v16 = vpop.permute.xlu1 %1066  ;;  %v3889_v60 = vpop.permute.xlu0 %1034  ;;  %v1560_v28 = vsel %vm1541_vm1, %v1527_v42, %v3435_v47  ;;  %v2498_v46 = vld [vmem:[%s2892_s27 + $0xaa] sm:$0xff] }
 0x193   : > { %v1593_v35 = vsel %vm1574_vm3, %v1560_v28, %v3646_v41  ;;  %v2513_v41 = vld [vmem:[%s2892_s27 + $0x15a] sm:$0xff] }
 0x194   : > { %1206 = vrot.lane.b32.xlu1 %v4501_v32, %s2812_s5  ;;  %1174 = vrot.lane.b32.xlu0 %v2433_v44, %s2812_s5  ;;  %v2465_v32 = vld [vmem:[%s2892_s27 + $0x99] sm:$0xff]  ;;  %v1626_v37 = vsel %vm1607_vm4, %v1593_v35, %v3812_v57 }
 0x196   : > { %v1193_v14 = vpop.permute.xlu1 %1192  ;;  %v1161_v36 = vpop.permute.xlu0 %1160 }
 0x197   : > { %v1806_v7 = vld [vmem:[#allocation2 + $0x8] sm:$0xff]  ;;  %v1676_v12 = vsel %vm1673_vm6, %v1643_v26, %v1161_v36  ;;  %v2497_v36 = vld [vmem:[%s2892_s27 + $0x9a] sm:$0xff] }
 0x198   : > { %v1822_v45 = vld [vmem:[#allocation2 + $0x88] sm:$0xff]  ;;  %1332 = vrot.lane.b32.xlu1 %v2480_v54, %s2813_s6  ;;  %1300 = vrot.lane.b32.xlu0 %v2464_v63, %s2813_s6 }
 0x199   : > { %2607 = vmatmul.mubr.msk.f32.vlgmr.msra.gmra.mxu0 %vm1772_vm9, %v1806_v7  ;;  %2631 = vmatmul.mubr.msk.f32.vlgmr.msra.gmra.mxu1 %vm1772_vm9, %v1822_v45  ;;  %v1659_v7 = vsel %vm1640_vm5, %v1626_v37, %v3858_v58  ;;  %v2482_v37 = vld [vmem:[%s2892_s27 + $0x169] sm:$0xff] }
 0x19a   : > { %v1195_v39 = vpop.permute.xlu1 %1194  ;;  %v1163_v27 = vpop.permute.xlu0 %1162  ;;  %v1692_v47 = vsel %vm1673_vm6, %v1659_v7, %v1193_v14  ;;  %v4552_v14 = vld [vmem:[#allocation45_spill] sm:$0xff] }
 0x19c   : > { %1302 = vrot.lane.b32.xlu1 %v2465_v32, %s2813_s6  ;;  %952 = vrot.lane.b32.xlu0 %v2480_v54, %s2810_s3 }
 0x19e   : > { %v1321_v1 = vpop.permute.xlu1 %1320  ;;  %v1289_v21 = vpop.permute.xlu0 %1288 }
 0x19f   : > { %v1709_v33 = vsel %vm1706_vm7, %v1676_v12, %v1289_v21  ;;  %v1725_v45 = vsel %vm1706_vm7, %v1692_v47, %v1321_v1  ;;  %v4548_v21 = vld [vmem:[#allocation25_spill] sm:$0xff]  ;;  %v1561_v1 = vsel %vm1541_vm1, %v1528_v62, %v3433_v9 }
 0x1a0   : > { %1428 = vrot.lane.b32.xlu1 %v2496_v22, %s2814_s15  ;;  %1334 = vrot.lane.b32.xlu0 %v2481_v17, %s2813_s6  ;;  %v1512_v58 = vsel %vm1508_vm0, %v4549_v50, %v4548_v21  ;;  %v2467_v21 = vld [vmem:[%s2892_s27 + $0xb1] sm:$0xff] }
 0x1a2   : > { %v1291_v56 = vpop.permute.xlu1 %1290  ;;  %v3915_v13 = vpop.permute.xlu0 %940 }
 0x1a4   : > { %954 = vrot.lane.b32.xlu1 %v2481_v17, %s2810_s3  ;;  %1460 = vrot.lane.b32.xlu0 %v2512_v8, %s2814_s15 }
 0x1a6   : > { %v1417_v44 = vpop.permute.xlu1 %1416  ;;  %v1323_v54 = vpop.permute.xlu0 %1322 }
 0x1a7   : > { %v1742_v63 = vsel %vm1739_vm8, %v1709_v33, %v1417_v44 }
 0x1a8   : > { %1775 = vst.msk [vmem:[#allocation2 + $0x10] sm:$0xff] %vm1772_vm9, %v1742_v63  ;;  %1080 = vrot.lane.b32.xlu1 %v2512_v8, %s2811_s4  ;;  %1048 = vrot.lane.b32.xlu0 %v2496_v22, %s2811_s4  ;;  %v1545_v22 = vsel %vm1541_vm1, %v1512_v58, %v4552_v14  ;;  %v1594_v8 = vsel %vm1574_vm3, %v1561_v1, %v3644_v43  ;;  %v2466_v63 = vld [vmem:[%s2892_s27 + $0xa9] sm:$0xff] }
 0x1a9   : > { %v1578_v29 = vsel %vm1574_vm3, %v1545_v22, %v3550_v15  ;;  %v1627_v19 = vsel %vm1607_vm4, %v1594_v8, %v3839_v52  ;;  %v2434_v52 = vld [vmem:[%s2892_s27 + $0xa8] sm:$0xff]  ;;  %v1612_v22 = vsel %vm1607_vm4, %v3570_v3, %v3743_v18 }
 0x1aa   : > { %v3943_v32 = vpop.permute.xlu1 %942  ;;  %v1449_v57 = vpop.permute.xlu0 %1448  ;;  %v1611_v38 = vsel %vm1607_vm4, %v1578_v29, %v3733_v10  ;;  %v1660_v9 = vsel %vm1640_vm5, %v1627_v19, %v3887_v16  ;;  %v2450_v10 = vld [vmem:[%s2892_s27 + $0x168] sm:$0xff] }
 0x1ab   : > { %v1758_v17 = vsel %vm1739_vm8, %v1725_v45, %v1449_v57  ;;  %v1644_v26 = vsel %vm1640_vm5, %v1611_v38, %v3889_v60  ;;  %v1693_v15 = vsel %vm1673_vm6, %v1660_v9, %v1195_v39 }
 0x1ac   : > { %1791 = vst.msk [vmem:[#allocation2 + $0x90] sm:$0xff] %vm1772_vm9, %v1758_v17  ;;  %1462 = vrot.lane.b32.xlu1 %v2513_v41, %s2814_s15  ;;  %1430 = vrot.lane.b32.xlu0 %v2497_v36, %s2814_s15  ;;  %v1677_v43 = vsel %vm1673_vm6, %v1644_v26, %v1163_v27  ;;  %v1726_v16 = vsel %vm1706_vm7, %v1693_v15, %v1323_v54  ;;  %v2451_v27 = vld [vmem:[%s2892_s27 + $0x170] sm:$0xff] }
 0x1ad   : > { %v1710_v28 = vsel %vm1706_vm7, %v1677_v43, %v1291_v56  ;;  %v2435_v56 = vld [vmem:[%s2892_s27 + $0xb0] sm:$0xff] }
 0x1ae   : > { %v3963_v51 = vpop.permute.xlu1 %1068  ;;  %v1037_v59 = vpop.permute.xlu0 %1036  ;;  %v2483_v17 = vld [vmem:[%s2892_s27 + $0x171] sm:$0xff] }
 0x1af   : > { %v1807_v42 = vld [vmem:[#allocation2 + $0x10] sm:$0xff]  ;;  %v1645_v1 = vsel %vm1640_vm5, %v1612_v22, %v1037_v59 }
 0x1b0   : > { %1082 = vrot.lane.b32.xlu1 %v2513_v41, %s2811_s4  ;;  %1050 = vrot.lane.b32.xlu0 %v2497_v36, %s2811_s4  ;;  %v2469_v22 = vld [vmem:[%s2892_s27 + $0xc9] sm:$0xff] }
 0x1b1   : > { %2609 = vmatprep.mubr.msk.f32.mxu0 %vm1772_vm9, %v1807_v42  ;;  %v1628_v42 = vsel %vm1607_vm4, %v3658_v6, %v3915_v13  ;;  %v2515_v13 = vld [vmem:[%s2892_s27 + $0x172] sm:$0xff] }
 0x1b2   : > { %v1451_v12 = vpop.permute.xlu1 %1450  ;;  %v1419_v60 = vpop.permute.xlu0 %1418  ;;  %v1661_v18 = vsel %vm1640_vm5, %v1628_v42, %v3963_v51  ;;  %v2499_v51 = vld [vmem:[%s2892_s27 + $0xb2] sm:$0xff]  ;;  %v2516_v42 = vld [vmem:[%s2892_s27 + $0x182] sm:$0xff] }
 0x1b3   : > { %v1759_v35 = vsel %vm1739_vm8, %v1726_v16, %v1451_v12  ;;  %v1743_v39 = vsel %vm1739_vm8, %v1710_v28, %v1419_v60  ;;  %v1823_v33 = vld [vmem:[#allocation2 + $0x90] sm:$0xff]  ;;  %v1629_v28 = vsel %vm1607_vm4, %v3654_v31, %v3943_v32 }
 0x1b4   : > { %1792 = vst.msk [vmem:[#allocation2 + $0x98] sm:$0xff] %vm1772_vm9, %v1759_v35  ;;  %1776 = vst.msk [vmem:[#allocation2 + $0x18] sm:$0xff] %vm1772_vm9, %v1743_v39  ;;  %1208 = vrot.lane.b32.xlu1 %v2450_v10, %s2812_s5  ;;  %1176 = vrot.lane.b32.xlu0 %v2434_v52, %s2812_s5  ;;  %v1613_v52 = vsel %vm1607_vm4, %v3566_v11, %v3741_v49 }
 0x1b5   : > { %2633 = vmatprep.mubr.msk.f32.mxu1 %vm1772_vm9, %v1823_v33 }
 0x1b6   : > { %v1071_v44 = vpop.permute.xlu1 %1070  ;;  %v1039_v54 = vpop.permute.xlu0 %1038 }
 0x1b7   : > { %v1662_v12 = vsel %vm1640_vm5, %v1629_v28, %v1071_v44  ;;  %v1646_v60 = vsel %vm1640_vm5, %v1613_v52, %v1039_v54  ;;  %v2452_v44 = vld [vmem:[%s2892_s27 + $0x180] sm:$0xff]  ;;  %v1615_v52 = vsel %vm1607_vm4, %v3578_v23, %v3748_v61  ;;  %v2517_v23 = vld [vmem:[%s2892_s27 + $0x18a] sm:$0xff] }
 0x1b8   : > { %1210 = vrot.lane.b32.xlu1 %v2451_v27, %s2812_s5  ;;  %1178 = vrot.lane.b32.xlu0 %v2435_v56, %s2812_s5  ;;  %v2436_v54 = vld [vmem:[%s2892_s27 + $0xc0] sm:$0xff]  ;;  %v2501_v61 = vld [vmem:[%s2892_s27 + $0xca] sm:$0xff] }
 0x1ba   : > { %v1197_v7 = vpop.permute.xlu1 %1196  ;;  %v1165_v47 = vpop.permute.xlu0 %1164 }
 0x1bb   : > { %v1808_v41 = vld [vmem:[#allocation2 + $0x18] sm:$0xff]  ;;  %v1678_v29 = vsel %vm1673_vm6, %v1645_v1, %v1165_v47  ;;  %v1694_v59 = vsel %vm1673_vm6, %v1661_v18, %v1197_v7  ;;  %v2453_v7 = vld [vmem:[%s2892_s27 + $0x188] sm:$0xff] }
 0x1bc   : > { %v1824_v36 = vld [vmem:[#allocation2 + $0x98] sm:$0xff]  ;;  %1336 = vrot.lane.b32.xlu1 %v2482_v37, %s2813_s6  ;;  %1304 = vrot.lane.b32.xlu0 %v2466_v63, %s2813_s6  ;;  %v2437_v47 = vld [vmem:[%s2892_s27 + $0xc8] sm:$0xff] }
 0x1bd   : > { %2610 = vmatmul.mubr.msk.f32.gmra.mxu0 %vm1772_vm9, %v1808_v41  ;;  %2634 = vmatmul.mubr.msk.f32.gmra.mxu1 %vm1772_vm9, %v1824_v36 }
 0x1be   : > { %v1199_v45 = vpop.permute.xlu1 %1198  ;;  %v1167_v57 = vpop.permute.xlu0 %1166 }
 0x1bf   : > { %v1695_v35 = vsel %vm1673_vm6, %v1662_v12, %v1199_v45  ;;  %v1679_v39 = vsel %vm1673_vm6, %v1646_v60, %v1167_v57 }
 0x1c0   : > { %956 = vrot.lane.b32.xlu1 %v2482_v37, %s2810_s3  ;;  %924 = vrot.lane.b32.xlu0 %v2466_v63, %s2810_s3 }
 0x1c2   : > { %v1325_v50 = vpop.permute.xlu1 %1324  ;;  %v1293_v58 = vpop.permute.xlu0 %1292 }
 0x1c3   : > { %v1711_v8 = vsel %vm1706_vm7, %v1678_v29, %v1293_v58  ;;  %v1727_v9 = vsel %vm1706_vm7, %v1694_v59, %v1325_v50 }
 0x1c4   : > { %1338 = vrot.lane.b32.xlu1 %v2483_v17, %s2813_s6  ;;  %1306 = vrot.lane.b32.xlu0 %v2467_v21, %s2813_s6 }
 0x1c6   : > { %v1295_v62 = vpop.permute.xlu1 %1294  ;;  %v4007_v14 = vpop.permute.xlu0 %944 }
 0x1c7   : > { %v1712_v11 = vsel %vm1706_vm7, %v1679_v39, %v1295_v62  ;;  %v2485_v62 = vld [vmem:[%s2892_s27 + $0x189] sm:$0xff] }
 0x1c8   : > { %1464 = vrot.lane.b32.xlu1 %v2514_v30, %s2814_s15  ;;  %1432 = vrot.lane.b32.xlu0 %v2498_v46, %s2814_s15 }
 0x1ca   : > { %v1421_v38 = vpop.permute.xlu1 %1420  ;;  %v1327_v19 = vpop.permute.xlu0 %1326 }
 0x1cb   : > { %v1744_v3 = vsel %vm1739_vm8, %v1711_v8, %v1421_v38  ;;  %v1728_v31 = vsel %vm1706_vm7, %v1695_v35, %v1327_v19  ;;  %v1614_v8 = vsel %vm1607_vm4, %v3582_v55, %v3750_v53 }
 0x1cc   : > { %1777 = vst.msk [vmem:[#allocation2 + $0x20] sm:$0xff] %vm1772_vm9, %v1744_v3  ;;  %958 = vrot.lane.b32.xlu1 %v2483_v17, %s2810_s3  ;;  %926 = vrot.lane.b32.xlu0 %v2467_v21, %s2810_s3  ;;  %v2484_v17 = vld [vmem:[%s2892_s27 + $0x181] sm:$0xff] }
 0x1cd   : > { %v2468_v21 = vld [vmem:[%s2892_s27 + $0xc1] sm:$0xff] }
 0x1ce   : > { %v4028_v26 = vpop.permute.xlu1 %946  ;;  %v1453_v15 = vpop.permute.xlu0 %1452  ;;  %v2500_v3 = vld [vmem:[%s2892_s27 + $0xc2] sm:$0xff] }
 0x1cf   : > { %v1760_v6 = vsel %vm1739_vm8, %v1727_v9, %v1453_v15  ;;  %v1630_v15 = vsel %vm1607_vm4, %v3670_v48, %v4007_v14  ;;  %v1631_v28 = vsel %vm1607_vm4, %v3666_v5, %v4028_v26 }
 0x1d0   : > { %1793 = vst.msk [vmem:[#allocation2 + $0xa0] sm:$0xff] %vm1772_vm9, %v1760_v6  ;;  %1084 = vrot.lane.b32.xlu1 %v2514_v30, %s2811_s4  ;;  %1052 = vrot.lane.b32.xlu0 %v2498_v46, %s2811_s4 }
 0x1d2   : > { %v4036_v43 = vpop.permute.xlu1 %1072  ;;  %v1041_v10 = vpop.permute.xlu0 %1040 }
 0x1d3   : > { %v1809_v16 = vld [vmem:[#allocation2 + $0x20] sm:$0xff]  ;;  %v1647_v38 = vsel %vm1640_vm5, %v1614_v8, %v1041_v10  ;;  %v1663_v53 = vsel %vm1640_vm5, %v1630_v15, %v4036_v43 }
 0x1d4   : > { %1466 = vrot.lane.b32.xlu1 %v2515_v13, %s2814_s15  ;;  %1434 = vrot.lane.b32.xlu0 %v2499_v51, %s2814_s15 }
 0x1d5   : > { %2612 = vmatprep.mubr.msk.f32.mxu0 %vm1772_vm9, %v1809_v16 }
 0x1d6   : > { %v1455_v49 = vpop.permute.xlu1 %1454  ;;  %v1423_v32 = vpop.permute.xlu0 %1422 }
 0x1d7   : > { %v1761_v33 = vsel %vm1739_vm8, %v1728_v31, %v1455_v49  ;;  %v1745_v27 = vsel %vm1739_vm8, %v1712_v11, %v1423_v32  ;;  %v1825_v56 = vld [vmem:[#allocation2 + $0xa0] sm:$0xff] }
 0x1d8   : > { %1794 = vst.msk [vmem:[#allocation2 + $0xa8] sm:$0xff] %vm1772_vm9, %v1761_v33  ;;  %1778 = vst.msk [vmem:[#allocation2 + $0x28] sm:$0xff] %vm1772_vm9, %v1745_v27  ;;  %1086 = vrot.lane.b32.xlu1 %v2515_v13, %s2811_s4  ;;  %1054 = vrot.lane.b32.xlu0 %v2499_v51, %s2811_s4 }
 0x1d9   : > { %2636 = vmatprep.mubr.msk.f32.mxu1 %vm1772_vm9, %v1825_v56 }
 0x1da   : > { %v1075_v37 = vpop.permute.xlu1 %1074  ;;  %v1043_v63 = vpop.permute.xlu0 %1042 }
 0x1db   : > { %v1664_v12 = vsel %vm1640_vm5, %v1631_v28, %v1075_v37  ;;  %v1648_v60 = vsel %vm1640_vm5, %v1615_v52, %v1043_v63 }
 0x1dc   : > { %1212 = vrot.lane.b32.xlu1 %v2452_v44, %s2812_s5  ;;  %1180 = vrot.lane.b32.xlu0 %v2436_v54, %s2812_s5  ;;  %v2454_v44 = vld [vmem:[%s2892_s27 + $0x198] sm:$0xff] }
 0x1dd   : > { %v2438_v54 = vld [vmem:[%s2892_s27 + $0xd8] sm:$0xff] }
 0x1de   : > { %v1201_v41 = vpop.permute.xlu1 %1200  ;;  %v1169_v36 = vpop.permute.xlu0 %1168 }
 0x1df   : > { %v1810_v45 = vld [vmem:[#allocation2 + $0x28] sm:$0xff]  ;;  %v1680_v19 = vsel %vm1673_vm6, %v1647_v38, %v1169_v36  ;;  %v1696_v6 = vsel %vm1673_vm6, %v1663_v53, %v1201_v41  ;;  %v2455_v41 = vld [vmem:[%s2892_s27 + $0x1a0] sm:$0xff] }
 0x1e0   : > { %v1826_v57 = vld [vmem:[#allocation2 + $0xa8] sm:$0xff]  ;;  %1214 = vrot.lane.b32.xlu1 %v2453_v7, %s2812_s5  ;;  %1182 = vrot.lane.b32.xlu0 %v2437_v47, %s2812_s5  ;;  %v2439_v36 = vld [vmem:[%s2892_s27 + $0xe0] sm:$0xff] }
 0x1e1   : > { %2613 = vmatmul.mubr.msk.f32.gmra.mxu0 %vm1772_vm9, %v1810_v45  ;;  %2637 = vmatmul.mubr.msk.f32.gmra.mxu1 %vm1772_vm9, %v1826_v57  ;;  %v2503_v53 = vld [vmem:[%s2892_s27 + $0xe2] sm:$0xff] }
 0x1e2   : > { %v1203_v50 = vpop.permute.xlu1 %1202  ;;  %v1171_v58 = vpop.permute.xlu0 %1170 }
 0x1e3   : > { %v1697_v35 = vsel %vm1673_vm6, %v1664_v12, %v1203_v50  ;;  %v1681_v39 = vsel %vm1673_vm6, %v1648_v60, %v1171_v58 }
 0x1e4   : > { %1340 = vrot.lane.b32.xlu1 %v2484_v17, %s2813_s6  ;;  %1308 = vrot.lane.b32.xlu0 %v2468_v21, %s2813_s6 }
 0x1e6   : > { %v1329_v30 = vpop.permute.xlu1 %1328  ;;  %v1297_v46 = vpop.permute.xlu0 %1296 }
 0x1e7   : > { %v1713_v18 = vsel %vm1706_vm7, %v1680_v19, %v1297_v46  ;;  %v1729_v13 = vsel %vm1706_vm7, %v1696_v6, %v1329_v30  ;;  %v2487_v30 = vld [vmem:[%s2892_s27 + $0x1a1] sm:$0xff] }
 0x1e8   : > { %960 = vrot.lane.b32.xlu1 %v2484_v17, %s2810_s3  ;;  %928 = vrot.lane.b32.xlu0 %v2468_v21, %s2810_s3  ;;  %v2486_v17 = vld [vmem:[%s2892_s27 + $0x199] sm:$0xff]  ;;  %v2471_v46 = vld [vmem:[%s2892_s27 + $0xe1] sm:$0xff] }
 0x1e9   : > { %v2470_v21 = vld [vmem:[%s2892_s27 + $0xd9] sm:$0xff] }
 0x1ea   : > { %v1299_v1 = vpop.permute.xlu1 %1298  ;;  %v4078_v29 = vpop.permute.xlu0 %948  ;;  %v2518_v19 = vld [vmem:[%s2892_s27 + $0x19a] sm:$0xff] }
 0x1eb   : > { %v1714_v11 = vsel %vm1706_vm7, %v1681_v39, %v1299_v1  ;;  %v1616_v1 = vsel %vm1607_vm4, %v3594_v20, %v3757_v2  ;;  %v1632_v20 = vsel %vm1607_vm4, %v3682_v0, %v4078_v29 }
 0x1ec   : > { %1342 = vrot.lane.b32.xlu1 %v2485_v62, %s2813_s6  ;;  %1310 = vrot.lane.b32.xlu0 %v2469_v22, %s2813_s6 }
 0x1ee   : > { %v1425_v59 = vpop.permute.xlu1 %1424  ;;  %v1331_v9 = vpop.permute.xlu0 %1330 }
 0x1ef   : > { %v1746_v55 = vsel %vm1739_vm8, %v1713_v18, %v1425_v59  ;;  %v1730_v5 = vsel %vm1706_vm7, %v1697_v35, %v1331_v9 }
 0x1f0   : > { %1779 = vst.msk [vmem:[#allocation2 + $0x30] sm:$0xff] %vm1772_vm9, %v1746_v55  ;;  %1468 = vrot.lane.b32.xlu1 %v2516_v42, %s2814_s15  ;;  %1436 = vrot.lane.b32.xlu0 %v2500_v3, %s2814_s15  ;;  %v2519_v55 = vld [vmem:[%s2892_s27 + $0x1a2] sm:$0xff] }
 0x1f2   : > { %v4101_v51 = vpop.permute.xlu1 %950  ;;  %v1457_v10 = vpop.permute.xlu0 %1456 }
 0x1f3   : > { %v1762_v48 = vsel %vm1739_vm8, %v1729_v13, %v1457_v10 }
 0x1f4   : > { %1795 = vst.msk [vmem:[#allocation2 + $0xb0] sm:$0xff] %vm1772_vm9, %v1762_v48  ;;  %962 = vrot.lane.b32.xlu1 %v2485_v62, %s2810_s3  ;;  %930 = vrot.lane.b32.xlu0 %v2469_v22, %s2810_s3 }
 0x1f6   : > { %v4107_v14 = vpop.permute.xlu1 %1076  ;;  %v1045_v43 = vpop.permute.xlu0 %1044 }
 0x1f7   : > { %v1811_v16 = vld [vmem:[#allocation2 + $0x30] sm:$0xff]  ;;  %v1649_v8 = vsel %vm1640_vm5, %v1616_v1, %v1045_v43  ;;  %v1665_v9 = vsel %vm1640_vm5, %v1632_v20, %v4107_v14  ;;  %v1617_v14 = vsel %vm1607_vm4, %v3590_v4, %v3755_v34  ;;  %v1633_v43 = vsel %vm1607_vm4, %v3678_v25, %v4101_v51 }
 0x1f8   : > { %1088 = vrot.lane.b32.xlu1 %v2516_v42, %s2811_s4  ;;  %1056 = vrot.lane.b32.xlu0 %v2500_v3, %s2811_s4  ;;  %v2502_v42 = vld [vmem:[%s2892_s27 + $0xda] sm:$0xff]  ;;  %s170_s27 = sand.u32 1, %s2789_s10  }
 0x1f9   : > { %2615 = vmatprep.mubr.msk.f32.mxu0 %vm1772_vm9, %v1811_v16  ;;  %s2326_s30 = sshll.u32 %s170_s27, 8 }
 0x1fa   : > { %v1459_v26 = vpop.permute.xlu1 %1458  ;;  %v1427_v31 = vpop.permute.xlu0 %1426  ;;  %s4246_s3 = scalar_lea.vmem [#allocation3], %s2326_s30 }
 0x1fb   : > { %v1763_v49 = vsel %vm1739_vm8, %v1730_v5, %v1459_v26  ;;  %v1747_v32 = vsel %vm1739_vm8, %v1714_v11, %v1427_v31  ;;  %v1827_v33 = vld [vmem:[#allocation2 + $0xb0] sm:$0xff] }
 0x1fc   : > { %1796 = vst.msk [vmem:[#allocation2 + $0xb8] sm:$0xff] %vm1772_vm9, %v1763_v49  ;;  %1780 = vst.msk [vmem:[#allocation2 + $0x38] sm:$0xff] %vm1772_vm9, %v1747_v32  ;;  %1470 = vrot.lane.b32.xlu1 %v2517_v23, %s2814_s15  ;;  %1438 = vrot.lane.b32.xlu0 %v2501_v61, %s2814_s15 }
 0x1fd   : > { %2639 = vmatprep.mubr.msk.f32.mxu1 %vm1772_vm9, %v1827_v33 }
 0x1fe   : > { %v1079_v27 = vpop.permute.xlu1 %1078  ;;  %v1047_v56 = vpop.permute.xlu0 %1046 }
 0x1ff   : > { %v1666_v28 = vsel %vm1640_vm5, %v1633_v43, %v1079_v27  ;;  %v1650_v16 = vsel %vm1640_vm5, %v1617_v14, %v1047_v56 }
 0x200   : > { %1090 = vrot.lane.b32.xlu1 %v2517_v23, %s2811_s4  ;;  %1058 = vrot.lane.b32.xlu0 %v2501_v61, %s2811_s4  ;;  %s2558_s4 = sshll.u32 %s2797_s12, 12  ;;  %s4365_s12 = scalar_lea.sflag [#allocation4], %s170_s27 }
 0x201   : > { %s4355_s8 = scalar_lea.hbm %s4413_s2, %s2558_s4 }
 0x202   : > { %v1205_v37 = vpop.permute.xlu1 %1204  ;;  %v1173_v63 = vpop.permute.xlu0 %1172 }
 0x203   : > { %v1812_v7 = vld [vmem:[#allocation2 + $0x38] sm:$0xff]  ;;  %v1682_v38 = vsel %vm1673_vm6, %v1649_v8, %v1173_v63  ;;  %v1698_v15 = vsel %vm1673_vm6, %v1665_v9, %v1205_v37  ;;  %v4554_v8 = vld [vmem:[#allocation11_spill] sm:$0xff] }
 0x204   : > { %v1828_v47 = vld [vmem:[#allocation2 + $0xb8] sm:$0xff]  ;;  %1216 = vrot.lane.b32.xlu1 %v2454_v44, %s2812_s5  ;;  %1184 = vrot.lane.b32.xlu0 %v2438_v54, %s2812_s5 }
 0x205   : > { %2616 = vmatmul.mubr.msk.f32.gmra.mxu0 %vm1772_vm9, %v1812_v7  ;;  %2640 = vmatmul.mubr.msk.f32.gmra.mxu1 %vm1772_vm9, %v1828_v47  ;;  %v1618_v7 = vsel %vm1607_vm4, %v3606_v24, %v3765_v40  ;;  %v4553_v47 = vld [vmem:[#allocation40_spill] sm:$0xff] }
 0x206   : > { %v1207_v45 = vpop.permute.xlu1 %1206  ;;  %v1175_v57 = vpop.permute.xlu0 %1174 }
 0x207   : > { %v1699_v12 = vsel %vm1673_vm6, %v1666_v28, %v1207_v45  ;;  %v1683_v60 = vsel %vm1673_vm6, %v1650_v16, %v1175_v57 }
 0x208   : > { %1218 = vrot.lane.b32.xlu1 %v2455_v41, %s2812_s5  ;;  %1186 = vrot.lane.b32.xlu0 %v2439_v36, %s2812_s5  ;;  %s2218_s5 = sshll.u32 %s4246_s3, 4  ;;  %s4359_s5 = int_to_ptr.vmem [resolvable:$true] %s2218_s5 }
 0x209   : > { %p2736_p1 = scmp.lt.s32.totalorder %s4359_s5, %s2734_s18 }
 0x20a   : > { %v1333_v50 = vpop.permute.xlu1 %1332  ;;  %v1301_v58 = vpop.permute.xlu0 %1300 }
 0x20b   : > { %v1715_v3 = vsel %vm1706_vm7, %v1682_v38, %v1301_v58  ;;  %v1731_v6 = vsel %vm1706_vm7, %v1698_v15, %v1333_v50  ;;  %v4555_v38 = vld [vmem:[#allocation37_spill] sm:$0xff] }
 0x20c   : > { %1344 = vrot.lane.b32.xlu1 %v2486_v17, %s2813_s6  ;;  %1312 = vrot.lane.b32.xlu0 %v2470_v21, %s2813_s6 }
 0x20e   : > { %v1303_v62 = vpop.permute.xlu1 %1302  ;;  %v4151_v22 = vpop.permute.xlu0 %952 }
 0x20f   : > { %v1716_v35 = vsel %vm1706_vm7, %v1683_v60, %v1303_v62  ;;  %v1634_v41 = vsel %vm1607_vm4, %v4553_v47, %v4151_v22 }
 0x210   : > { %1346 = vrot.lane.b32.xlu1 %v2487_v30, %s2813_s6  ;;  %1314 = vrot.lane.b32.xlu0 %v2471_v46, %s2813_s6 }
 0x212   : > { %v1429_v18 = vpop.permute.xlu1 %1428  ;;  %v1335_v59 = vpop.permute.xlu0 %1334 }
 0x213   : > { %v1748_v2 = vsel %vm1739_vm8, %v1715_v3, %v1429_v18  ;;  %v1732_v39 = vsel %vm1706_vm7, %v1699_v12, %v1335_v59 }
 0x214   : > { %1781 = vst.msk [vmem:[#allocation2 + $0x40] sm:$0xff] %vm1772_vm9, %v1748_v2  ;;  %1472 = vrot.lane.b32.xlu1 %v2518_v19, %s2814_s15  ;;  %1440 = vrot.lane.b32.xlu0 %v2502_v42, %s2814_s15  ;;  %v1619_v19 = vsel %vm1607_vm4, %v4555_v38, %v4554_v8  ;;  %v4556_v42 = vld [vmem:[#allocation39_spill] sm:$0xff] }
 0x216   : > { %v955_v13 = vpop.permute.xlu1 %954  ;;  %v1461_v10 = vpop.permute.xlu0 %1460 }
 0x217   : > { %v1764_v0 = vsel %vm1739_vm8, %v1731_v6, %v1461_v10  ;;  %v1635_v3 = vsel %vm1607_vm4, %v4556_v42, %v955_v13 }
 0x218   : > { %1797 = vst.msk [vmem:[#allocation2 + $0xc0] sm:$0xff] %vm1772_vm9, %v1764_v0  ;;  %1474 = vrot.lane.b32.xlu1 %v2519_v55, %s2814_s15  ;;  %1442 = vrot.lane.b32.xlu0 %v2503_v53, %s2814_s15  ;;  %s2729_s15 = scalar_lea.vmem %s4359_s5, 4096 }
 0x219   : > { %p2730_p12 = scmp.ne.s32.totalorder %s4359_s5, %s2729_s15  ;;  %p2737_p2 = scmp.lt.s32.totalorder %s2735_s20, %s2729_s15 }
 0x21a   : > { %v1081_v29 = vpop.permute.xlu1 %1080  ;;  %v1049_v48 = vpop.permute.xlu0 %1048 }
 0x21b   : > { %v1813_v52 = vld [vmem:[#allocation2 + $0x40] sm:$0xff]  ;;  %v1667_v36 = vsel %vm1640_vm5, %v1634_v41, %v1081_v29  ;;  %v1651_v45 = vsel %vm1640_vm5, %v1618_v7, %v1049_v48  ;;  %p2731_p13 = pnand %p2730_p12, %p2872_p4  ;;  %p2738_p3 = por %p2737_p2, %p2736_p1 }
 0x21c   : > { %2618 = vmatprep.mubr.msk.f32.mxu0 %vm1772_vm9, %v1813_v52 }
 0x21d   : > { %p2732_p0 = pneg %p2731_p13 }
 0x21e   : > { %v1463_v4 = vpop.permute.xlu1 %1462  ;;  %v1431_v34 = vpop.permute.xlu0 %1430 }
 0x21f   : > { %v1765_v23 = vsel %vm1739_vm8, %v1732_v39, %v1463_v4  ;;  %v1749_v25 = vsel %vm1739_vm8, %v1716_v35, %v1431_v34  ;;  %v1829_v51 = vld [vmem:[#allocation2 + $0xc0] sm:$0xff]  ;;  %p2739_p5 = pnand %p2738_p3, %p2732_p0 }
 0x220   : > { %1798 = vst.msk [vmem:[#allocation2 + $0xc8] sm:$0xff] %vm1772_vm9, %v1765_v23  ;;  %1782 = vst.msk [vmem:[#allocation2 + $0x48] sm:$0xff] %vm1772_vm9, %v1749_v25  ;;  %2642 = vmatprep.mubr.msk.f32.mxu1 %vm1772_vm9, %v1829_v51 }
 0x222   : > { %v1083_v61 = vpop.permute.xlu1 %1082  ;;  %v1051_v11 = vpop.permute.xlu0 %1050 }
 0x223   : > { %v1668_v20 = vsel %vm1640_vm5, %v1635_v3, %v1083_v61  ;;  %v1652_v2 = vsel %vm1640_vm5, %v1619_v19, %v1051_v11 }
 0x226   : > { %v1209_v5 = vpop.permute.xlu1 %1208  ;;  %v1177_v26 = vpop.permute.xlu0 %1176 }
 0x227   : > { %v1814_v31 = vld [vmem:[#allocation2 + $0x48] sm:$0xff]  ;;  %v1700_v57 = vsel %vm1673_vm6, %v1667_v36, %v1209_v5  ;;  %v1684_v17 = vsel %vm1673_vm6, %v1651_v45, %v1177_v26  ;;  %v4557_v5 = vld [vmem:[#allocation6_spill] sm:$0xff] }
 0x228   : > { %v1830_v49 = vld [vmem:[#allocation2 + $0xc8] sm:$0xff]  ;;  %2619 = vmatmul.mubr.msk.f32.gmra.mxu0 %vm1772_vm9, %v1814_v31  ;;  %v4558_v31 = vld [vmem:[#allocation38_spill] sm:$0xff] }
 0x229   : > { %2643 = vmatmul.mubr.msk.f32.gmra.mxu1 %vm1772_vm9, %v1830_v49 }
 0x22a   : > { %v1211_v32 = vpop.permute.xlu1 %1210  ;;  %v1179_v33 = vpop.permute.xlu0 %1178 }
 0x22b   : > { %v1701_v9 = vsel %vm1673_vm6, %v1668_v20, %v1211_v32  ;;  %v1685_v15 = vsel %vm1673_vm6, %v1652_v2, %v1179_v33 }
 0x22e   : > { %v1337_v27 = vpop.permute.xlu1 %1336  ;;  %v1305_v56 = vpop.permute.xlu0 %1304 }
 0x22f   : > { %v1733_v21 = vsel %vm1706_vm7, %v1700_v57, %v1337_v27  ;;  %v1717_v50 = vsel %vm1706_vm7, %v1684_v17, %v1305_v56  ;;  %v4559_v17 = vld [vmem:[#allocation12_spill] sm:$0xff] }
 0x232   : > { %v4200_v44 = vpop.permute.xlu1 %956  ;;  %v4202_v54 = vpop.permute.xlu0 %924 }
 0x233   : > { %v1636_v26 = vsel %vm1607_vm4, %v4557_v5, %v4200_v44  ;;  %v1620_v49 = vsel %vm1607_vm4, %v4558_v31, %v4202_v54  ;;  %v4563_v5 = vld [vmem:[#allocation18_spill] sm:$0xff] }
 0x236   : > { %v1339_v37 = vpop.permute.xlu1 %1338  ;;  %v1307_v63 = vpop.permute.xlu0 %1306 }
 0x237   : > { %v1734_v55 = vsel %vm1706_vm7, %v1701_v9, %v1339_v37  ;;  %v1718_v53 = vsel %vm1706_vm7, %v1685_v15, %v1307_v63 }
 0x23a   : > { %v1465_v58 = vpop.permute.xlu1 %1464  ;;  %v1433_v30 = vpop.permute.xlu0 %1432 }
 0x23b   : > { %v1766_v24 = vsel %vm1739_vm8, %v1733_v21, %v1465_v58  ;;  %v1750_v40 = vsel %vm1739_vm8, %v1717_v50, %v1433_v30  ;;  %v4560_v50 = vld [vmem:[#allocation43_spill] sm:$0xff] }
 0x23c   : > { %1799 = vst.msk [vmem:[#allocation2 + $0xd0] sm:$0xff] %vm1772_vm9, %v1766_v24  ;;  %1783 = vst.msk [vmem:[#allocation2 + $0x50] sm:$0xff] %vm1772_vm9, %v1750_v40 }
 0x23e   : > { %v4220_v46 = vpop.permute.xlu1 %958  ;;  %v4222_v62 = vpop.permute.xlu0 %926 }
 0x23f   : > { %v1637_v21 = vsel %vm1607_vm4, %v4559_v17, %v4220_v46  ;;  %v1621_v58 = vsel %vm1607_vm4, %v4560_v50, %v4222_v62 }
 0x242   : > { %v1085_v22 = vpop.permute.xlu1 %1084  ;;  %v1053_v1 = vpop.permute.xlu0 %1052 }
 0x243   : > { %v1815_v18 = vld [vmem:[#allocation2 + $0x50] sm:$0xff]  ;;  %v1669_v32 = vsel %vm1640_vm5, %v1636_v26, %v1085_v22  ;;  %v1653_v33 = vsel %vm1640_vm5, %v1620_v49, %v1053_v1 }
 0x244   : > { %v1831_v59 = vld [vmem:[#allocation2 + $0xd0] sm:$0xff]  ;;  %2621 = vmatprep.mubr.msk.f32.mxu0 %vm1772_vm9, %v1815_v18 }
 0x245   : > { %2645 = vmatprep.mubr.msk.f32.mxu1 %vm1772_vm9, %v1831_v59  ;;  %v4564_v26 = vld [vmem:[#allocation44_spill] sm:$0xff] }
 0x246   : > { %v1467_v6 = vpop.permute.xlu1 %1466  ;;  %v1435_v13 = vpop.permute.xlu0 %1434 }
 0x247   : > { %v1767_v10 = vsel %vm1739_vm8, %v1734_v55, %v1467_v6  ;;  %v1751_v0 = vsel %vm1739_vm8, %v1718_v53, %v1435_v13 }
 0x248   : > { %1800 = vst.msk [vmem:[#allocation2 + $0xd8] sm:$0xff] %vm1772_vm9, %v1767_v10  ;;  %1784 = vst.msk [vmem:[#allocation2 + $0x58] sm:$0xff] %vm1772_vm9, %v1751_v0 }
 0x24a   : > { %v1087_v29 = vpop.permute.xlu1 %1086  ;;  %v1055_v48 = vpop.permute.xlu0 %1054 }
 0x24b   : > { %v1670_v40 = vsel %vm1640_vm5, %v1637_v21, %v1087_v29  ;;  %v1654_v22 = vsel %vm1640_vm5, %v1621_v58, %v1055_v48 }
 0x24e   : > { %v1213_v14 = vpop.permute.xlu1 %1212  ;;  %v1181_v43 = vpop.permute.xlu0 %1180 }
 0x24f   : > { %v1816_v52 = vld [vmem:[#allocation2 + $0x58] sm:$0xff]  ;;  %v1702_v27 = vsel %vm1673_vm6, %v1669_v32, %v1213_v14  ;;  %v1686_v56 = vsel %vm1673_vm6, %v1653_v33, %v1181_v43 }
 0x250   : > { %v1832_v28 = vld [vmem:[#allocation2 + $0xd8] sm:$0xff]  ;;  %2622 = vmatmul.mubr.msk.f32.gmra.mxu0 %vm1772_vm9, %v1816_v52 }
 0x251   : > { %2646 = vmatmul.mubr.msk.f32.gmra.mxu1 %vm1772_vm9, %v1832_v28  ;;  %v4561_v52 = vld [vmem:[#allocation17_spill] sm:$0xff] }
 0x252   : > { %v1215_v16 = vpop.permute.xlu1 %1214  ;;  %v1183_v12 = vpop.permute.xlu0 %1182 }
 0x253   : > { %v1703_v1 = vsel %vm1673_vm6, %v1670_v40, %v1215_v16  ;;  %v1687_v8 = vsel %vm1673_vm6, %v1654_v22, %v1183_v12  ;;  %v4562_v16 = vld [vmem:[#allocation7_spill] sm:$0xff] }
 0x256   : > { %v1341_v60 = vpop.permute.xlu1 %1340  ;;  %v1309_v35 = vpop.permute.xlu0 %1308 }
 0x257   : > { %v1735_v37 = vsel %vm1706_vm7, %v1702_v27, %v1341_v60  ;;  %v1719_v63 = vsel %vm1706_vm7, %v1686_v56, %v1309_v35 }
 0x259   : > { %v2608_v39 = vpop.f32.mrf.mxu0  ;;  %v2632_v4 = vpop.f32.mrf.mxu1 }
 0x25a   : > { %2169 = vst [vmem:[%s4246_s3 + $0x8] sm:$0xff] %v2608_v39  ;;  %2185 = vst [vmem:[%s4246_s3 + $0x88] sm:$0xff] %v2632_v4  ;;  %v4250_v34 = vpop.permute.xlu1 %960  ;;  %v4252_v23 = vpop.permute.xlu0 %928 }
 0x25b   : > { %v2009_v25 = vpop.f32.mrf.mxu0  ;;  %v2089_v51 = vpop.f32.mrf.mxu1  ;;  %v1638_v28 = vsel %vm1607_vm4, %v4561_v52, %v4250_v34  ;;  %v1622_v12 = vsel %vm1607_vm4, %v4562_v16, %v4252_v23 }
 0x25c   : > { %2168 = vst [vmem:[%s4246_s3] sm:$0xff] %v2009_v25  ;;  %2184 = vst [vmem:[%s4246_s3 + $0x80] sm:$0xff] %v2089_v51 }
 0x25e   : > { %v1343_v61 = vpop.permute.xlu1 %1342  ;;  %v1311_v11 = vpop.permute.xlu0 %1310 }
 0x25f   : > { %v1736_v46 = vsel %vm1706_vm7, %v1703_v1, %v1343_v61  ;;  %v1720_v38 = vsel %vm1706_vm7, %v1687_v8, %v1311_v11 }
 0x262   : > { %v1469_v7 = vpop.permute.xlu1 %1468  ;;  %v1437_v47 = vpop.permute.xlu0 %1436 }
 0x263   : > { %v1768_v44 = vsel %vm1739_vm8, %v1735_v37, %v1469_v7  ;;  %v1752_v41 = vsel %vm1739_vm8, %v1719_v63, %v1437_v47 }
 0x264   : > { %1801 = vst.msk [vmem:[#allocation2 + $0xe0] sm:$0xff] %vm1772_vm9, %v1768_v44  ;;  %1785 = vst.msk [vmem:[#allocation2 + $0x60] sm:$0xff] %vm1772_vm9, %v1752_v41 }
 0x266   : > { %v963_v54 = vpop.permute.xlu1 %962  ;;  %v931_v36 = vpop.permute.xlu0 %930 }
 0x267   : > { %v1639_v34 = vsel %vm1607_vm4, %v4563_v5, %v963_v54  ;;  %v1623_v23 = vsel %vm1607_vm4, %v4564_v26, %v931_v36 }
 0x26a   : > { %v1089_v45 = vpop.permute.xlu1 %1088  ;;  %v1057_v57 = vpop.permute.xlu0 %1056 }
 0x26b   : > { %v1817_v30 = vld [vmem:[#allocation2 + $0x60] sm:$0xff]  ;;  %v1671_v60 = vsel %vm1640_vm5, %v1638_v28, %v1089_v45  ;;  %v1655_v35 = vsel %vm1640_vm5, %v1622_v12, %v1057_v57 }
 0x26c   : > { %v1833_v24 = vld [vmem:[#allocation2 + $0xe0] sm:$0xff]  ;;  %2624 = vmatprep.mubr.msk.f32.mxu0 %vm1772_vm9, %v1817_v30 }
 0x26d   : > { %2648 = vmatprep.mubr.msk.f32.mxu1 %vm1772_vm9, %v1833_v24 }
 0x26e   : > { %v1471_v19 = vpop.permute.xlu1 %1470  ;;  %v1439_v62 = vpop.permute.xlu0 %1438 }
 0x26f   : > { %v1769_v42 = vsel %vm1739_vm8, %v1736_v46, %v1471_v19  ;;  %v1753_v3 = vsel %vm1739_vm8, %v1720_v38, %v1439_v62 }
 0x270   : > { %1802 = vst.msk [vmem:[#allocation2 + $0xe8] sm:$0xff] %vm1772_vm9, %v1769_v42  ;;  %1786 = vst.msk [vmem:[#allocation2 + $0x68] sm:$0xff] %vm1772_vm9, %v1753_v3 }
 0x272   : > { %v1091_v18 = vpop.permute.xlu1 %1090  ;;  %v1059_v59 = vpop.permute.xlu0 %1058 }
 0x273   : > { %v1672_v32 = vsel %vm1640_vm5, %v1639_v34, %v1091_v18  ;;  %v1656_v33 = vsel %vm1640_vm5, %v1623_v23, %v1059_v59 }
 0x276   : > { %v1217_v20 = vpop.permute.xlu1 %1216  ;;  %v1185_v2 = vpop.permute.xlu0 %1184 }
 0x277   : > { %v1818_v9 = vld [vmem:[#allocation2 + $0x68] sm:$0xff]  ;;  %v1704_v39 = vsel %vm1673_vm6, %v1671_v60, %v1217_v20  ;;  %v1688_v4 = vsel %vm1673_vm6, %v1655_v35, %v1185_v2 }
 0x278   : > { %v1834_v15 = vld [vmem:[#allocation2 + $0xe8] sm:$0xff]  ;;  %2625 = vmatmul.mubr.msk.f32.gmra.mxu0 %vm1772_vm9, %v1818_v9 }
 0x279   : > { %2649 = vmatmul.mubr.msk.f32.gmra.mxu1 %vm1772_vm9, %v1834_v15 }
 0x27a   : > { %v1219_v55 = vpop.permute.xlu1 %1218  ;;  %v1187_v53 = vpop.permute.xlu0 %1186 }
 0x27b   : > { %v1705_v27 = vsel %vm1673_vm6, %v1672_v32, %v1219_v55  ;;  %v1689_v56 = vsel %vm1673_vm6, %v1656_v33, %v1187_v53 }
 0x27d   : > { %v2611_v6 = vpop.f32.mrf.mxu0  ;;  %v2635_v13 = vpop.f32.mrf.mxu1 }
 0x27e   : > { %2171 = vst [vmem:[%s4246_s3 + $0x18] sm:$0xff] %v2611_v6  ;;  %2187 = vst [vmem:[%s4246_s3 + $0x98] sm:$0xff] %v2635_v13  ;;  %v1345_v10 = vpop.permute.xlu1 %1344  ;;  %v1313_v0 = vpop.permute.xlu0 %1312 }
 0x27f   : > { %v2019_v29 = vpop.f32.mrf.mxu0  ;;  %v2099_v48 = vpop.f32.mrf.mxu1  ;;  %v1737_v25 = vsel %vm1706_vm7, %v1704_v39, %v1345_v10  ;;  %v1721_v51 = vsel %vm1706_vm7, %v1688_v4, %v1313_v0 }
 0x280   : > { %2170 = vst [vmem:[%s4246_s3 + $0x10] sm:$0xff] %v2019_v29  ;;  %2186 = vst [vmem:[%s4246_s3 + $0x90] sm:$0xff] %v2099_v48 }
 0x282   : > { %v1347_v14 = vpop.permute.xlu1 %1346  ;;  %v1315_v43 = vpop.permute.xlu0 %1314 }
 0x283   : > { %v1738_v37 = vsel %vm1706_vm7, %v1705_v27, %v1347_v14  ;;  %v1722_v63 = vsel %vm1706_vm7, %v1689_v56, %v1315_v43 }
 0x286   : > { %v1473_v61 = vpop.permute.xlu1 %1472  ;;  %v1441_v11 = vpop.permute.xlu0 %1440 }
 0x287   : > { %v1770_v31 = vsel %vm1739_vm8, %v1737_v25, %v1473_v61  ;;  %v1754_v49 = vsel %vm1739_vm8, %v1721_v51, %v1441_v11 }
 0x288   : > { %1803 = vst.msk [vmem:[#allocation2 + $0xf0] sm:$0xff] %vm1772_vm9, %v1770_v31  ;;  %1787 = vst.msk [vmem:[#allocation2 + $0x70] sm:$0xff] %vm1772_vm9, %v1754_v49 }
 0x28a   : > { %v1475_v7 = vpop.permute.xlu1 %1474  ;;  %v1443_v47 = vpop.permute.xlu0 %1442 }
 0x28b   : > { %v1771_v44 = vsel %vm1739_vm8, %v1738_v37, %v1475_v7  ;;  %v1755_v41 = vsel %vm1739_vm8, %v1722_v63, %v1443_v47 }
 0x28c   : > { %1804 = vst.msk [vmem:[#allocation2 + $0xf8] sm:$0xff] %vm1772_vm9, %v1771_v44  ;;  %1788 = vst.msk [vmem:[#allocation2 + $0x78] sm:$0xff] %vm1772_vm9, %v1755_v41 }
 0x28f   : > { %v1819_v54 = vld [vmem:[#allocation2 + $0x70] sm:$0xff] }
 0x290   : > { %v1835_v36 = vld [vmem:[#allocation2 + $0xf0] sm:$0xff]  ;;  %2627 = vmatprep.mubr.msk.f32.mxu0 %vm1772_vm9, %v1819_v54 }
 0x291   : > { %2651 = vmatprep.mubr.msk.f32.mxu1 %vm1772_vm9, %v1835_v36 }
 0x293   : > { %v1820_v45 = vld [vmem:[#allocation2 + $0x78] sm:$0xff] }
 0x294   : > { %v1836_v57 = vld [vmem:[#allocation2 + $0xf8] sm:$0xff]  ;;  %2628 = vmatmul.mubr.msk.f32.gmra.mxu0 %vm1772_vm9, %v1820_v45 }
 0x295   : > { %2652 = vmatmul.mubr.msk.f32.gmra.mxu1 %vm1772_vm9, %v1836_v57 }
 0x2a1   : > { %v2614_v17 = vpop.f32.mrf.mxu0  ;;  %v2638_v21 = vpop.f32.mrf.mxu1 }
 0x2a2   : > { %2173 = vst [vmem:[%s4246_s3 + $0x28] sm:$0xff] %v2614_v17  ;;  %2189 = vst [vmem:[%s4246_s3 + $0xa8] sm:$0xff] %v2638_v21 }
 0x2a3   : > { %v2029_v50 = vpop.f32.mrf.mxu0  ;;  %v2109_v58 = vpop.f32.mrf.mxu1 }
 0x2a4   : > { %2172 = vst [vmem:[%s4246_s3 + $0x20] sm:$0xff] %v2029_v50  ;;  %2188 = vst [vmem:[%s4246_s3 + $0xa0] sm:$0xff] %v2109_v58 }
 0x2c5   : > { %v2617_v30 = vpop.f32.mrf.mxu0  ;;  %v2641_v24 = vpop.f32.mrf.mxu1 }
 0x2c6   : > { %2175 = vst [vmem:[%s4246_s3 + $0x38] sm:$0xff] %v2617_v30  ;;  %2191 = vst [vmem:[%s4246_s3 + $0xb8] sm:$0xff] %v2641_v24 }
 0x2c7   : > { %v2039_v40 = vpop.f32.mrf.mxu0  ;;  %v2119_v22 = vpop.f32.mrf.mxu1 }
 0x2c8   : > { %2174 = vst [vmem:[%s4246_s3 + $0x30] sm:$0xff] %v2039_v40  ;;  %2190 = vst [vmem:[%s4246_s3 + $0xb0] sm:$0xff] %v2119_v22 }
 0x2e8   : > { %v2620_v1 = vpop.f32.mrf.mxu0 }
 0x2e9   : > { %v2644_v8 = vpop.f32.mrf.mxu1  ;;  %2177 = vst [vmem:[%s4246_s3 + $0x48] sm:$0xff] %v2620_v1 }
 0x2ea   : > { %2193 = vst [vmem:[%s4246_s3 + $0xc8] sm:$0xff] %v2644_v8  ;;  %v2049_v46 = vpop.f32.mrf.mxu0 }
 0x2eb   : > { %v2129_v38 = vpop.f32.mrf.mxu1  ;;  %2176 = vst [vmem:[%s4246_s3 + $0x40] sm:$0xff] %v2049_v46 }
 0x2ec   : > { %2192 = vst [vmem:[%s4246_s3 + $0xc0] sm:$0xff] %v2129_v38 }
 0x310   : > { %v2623_v19 = vpop.f32.mrf.mxu0 }
 0x311   : > { %v2647_v62 = vpop.f32.mrf.mxu1  ;;  %2179 = vst [vmem:[%s4246_s3 + $0x58] sm:$0xff] %v2623_v19 }
 0x312   : > { %2195 = vst [vmem:[%s4246_s3 + $0xd8] sm:$0xff] %v2647_v62  ;;  %v2059_v42 = vpop.f32.mrf.mxu0 }
 0x313   : > { %v2139_v3 = vpop.f32.mrf.mxu1  ;;  %2178 = vst [vmem:[%s4246_s3 + $0x50] sm:$0xff] %v2059_v42 }
 0x314   : > { %2194 = vst [vmem:[%s4246_s3 + $0xd0] sm:$0xff] %v2139_v3 }
 0x338   : > { %v2626_v18 = vpop.f32.mrf.mxu0 }
 0x339   : > { %v2650_v59 = vpop.f32.mrf.mxu1  ;;  %2181 = vst [vmem:[%s4246_s3 + $0x68] sm:$0xff] %v2626_v18 }
 0x33a   : > { %2197 = vst [vmem:[%s4246_s3 + $0xe8] sm:$0xff] %v2650_v59  ;;  %v2069_v20 = vpop.f32.mrf.mxu0 }
 0x33b   : > { %v2149_v2 = vpop.f32.mrf.mxu1  ;;  %2180 = vst [vmem:[%s4246_s3 + $0x60] sm:$0xff] %v2069_v20 }
 0x33c   : > { %2196 = vst [vmem:[%s4246_s3 + $0xe0] sm:$0xff] %v2149_v2 }
 0x354   : > { %v2629_v9 = vpop.f32.mrf.mxu0 }
 0x355   : > { %v2653_v15 = vpop.f32.mrf.mxu1  ;;  %2183 = vst [vmem:[%s4246_s3 + $0x78] sm:$0xff] %v2629_v9 }
 0x356   : > { %2199 = vst [vmem:[%s4246_s3 + $0xf8] sm:$0xff] %v2653_v15  ;;  %v2079_v55 = vpop.f32.mrf.mxu0 }
 0x357   : > { %v2159_v53 = vpop.f32.mrf.mxu1  ;;  %2182 = vst [vmem:[%s4246_s3 + $0x70] sm:$0xff] %v2079_v55 }
 0x358   : > { %2198 = vst [vmem:[%s4246_s3 + $0xf0] sm:$0xff] %v2159_v53 }
 0x359   : > { %2742 = shalt.err (!%p2739_p5)
}
 0x35a   : > { %s2743_s23 = scalar_lea.hbm %s4355_s8, 4096  ;;  %s2747_s26 = scalar_lea.hbm %s4413_s2, 8192 }
 0x35b   : > { %p2744_p6 = scmp.ne.s32.totalorder %s4355_s8, %s2743_s23  ;;  %p2748_p10 = scmp.lt.s32.totalorder %s4355_s8, %s4413_s2 }
 0x35c   : > { %p2749_p11 = scmp.lt.s32.totalorder %s2747_s26, %s2743_s23 }
 0x35d   : > { %p2745_p7 = pnand %p2744_p6, %p2872_p4 }
 0x35e   : > { %p2750_p12 = por %p2749_p11, %p2748_p10 }
 0x35f   : > { %p2746_p9 = pneg %p2745_p7 }
 0x361   : > { %p2751_p13 = pnand %p2750_p12, %p2746_p9 }
 0x363   : > { %2754 = shalt.err (!%p2751_p13)
}
 0x364   : > { %s2816_s30 = smov 128  }
 0x365   : > { %2665 = dma.vmem_to_hbm [thread:$0]  (%p2872_p4), %s4359_s5, 4096, %s4355_s8, %s4365_s12, %s2816_s30, %s2816_s30, %s2808_s29  }
 0x366 PF: > { %p2671_p0 = scmp.ge.s32.totalorder %s2805_s14, 2  ;;  %s2233_s3 = sand.u32 1, %s2785_s9  }
 0x367   : > { %s2234_s4 = scalar_lea.sflag [#allocation4], %s2233_s3 }
 0x368   : > { %p2668_p1 = pnand %p2671_p0, %p2879_p8 }
 0x36a   : > { %p2669_p2 = pneg %p2668_p1 }
 0x36c   : > { %2780 = dma.done.wait (%p2669_p2), %s2234_s4, 4096  }
 0x36d   : > { %2782 = vsyncadd (%p2669_p2), %s2234_s4, 4294963200  ;;  %s15_s14 = sadd.s32 1, %s2805_s14   ;;  %s4565_s9 = smov %s2789_s10 }
 0x36e   : > { %p12_p3 = scmp.ge.s32.totalorder %s15_s14, 4   ;;  %s4566_s10 = smov %s2793_s11 }
 0x36f   : > { %s4567_s11 = smov %s2885_s22  ;;  %s4568_s12 = smov %s2801_s13 }
 0x370   : > { %s4569_s13 = smov %s4571_s17  ;;  %14 = sbr.rel (!%p12_p3) target bundleno = 4 (0x4), region = 73 }
 0x375   :  { %2239 = vsyncpa [#allocation4], 1 }
 0x376   :  { %2241 = vsyncpa [#allocation4 + $0x1], 1 }

</bundles_post_ra>
